<compile_context>
chip_gen: v7x
topology: tpu7x:2x2x1
jax: 0.10.0
libtpu: 0.0.40
codegen_flags: <defaults>
</compile_context>

<pallas_src>
import jax
import jax.numpy as jnp
from jax.experimental import pallas as pl
from jax.experimental.pallas import tpu as pltpu

LANE = 128


def _cls_head_kernel(x_ref, w1_ref, b1_ref, w2_ref, b2_ref, o_ref):
    # x_ref : (TM, C)      pooled batch tile, bf16, feature axis lane-dense
    # w1_ref: (C, H)       fc1 weight, bf16, (in, out) layout
    # b1_ref: (1, H)       fc1 bias, f32
    # w2_ref: (H, CPAD)    fc2 weight, bf16, classes zero-padded to lane-dense width
    # b2_ref: (1, CPAD)    fc2 bias, f32 (padded)
    # o_ref : (TM, CPAD)   f32 sigmoid outputs (padded columns discarded outside)
    h = jnp.dot(x_ref[...], w1_ref[...], preferred_element_type=jnp.float32)
    h = jnp.maximum(h + b1_ref[...], 0.0)                          # fc1 bias + ReLU (f32)
    z = jnp.dot(h.astype(jnp.bfloat16), w2_ref[...],
                preferred_element_type=jnp.float32) + b2_ref[...]  # fc2 (bf16 MXU, f32 acc)
    e = jnp.exp(-z)                                                # EUP
    o_ref[...] = pl.reciprocal(1.0 + e, approx=True)               # EUP, keeps VALU free


def classification_head_forward(x, w1, b1, w2, b2, *, tm=128):
    """x: (N, C, L) f32; w1: (H, C); b1: (H,); w2: (n_classes, H); b2: (n_classes,).

    Returns sigmoid(fc2(relu(fc1(maxpool_L(x))))) of shape (N, n_classes).
    """
    N, C, L = x.shape
    H = w1.shape[0]
    n_classes = w2.shape[0]

    # AdaptiveMaxPool1d(1) + flatten, done in the wrapper: a single XLA reduce
    # over the contiguous minor L axis. The kernel then only reads N*C elements
    # (no transpose, no L-sized VMEM tile).
    pooled = jnp.max(x, axis=-1)                                   # (N, C)

    # ---- layout plumbing only ----
    n_pad = pl.cdiv(N, tm) * tm
    pooled_bf = pooled.astype(jnp.bfloat16)
    if n_pad != N:
        pooled_bf = jnp.pad(pooled_bf, ((0, n_pad - N), (0, 0)))
    c_pad = pl.cdiv(n_classes, LANE) * LANE                        # lane-dense class dim
    w1_t = jnp.transpose(w1).astype(jnp.bfloat16)                  # (C, H)
    w2_t = jnp.pad(jnp.transpose(w2),
                   ((0, 0), (0, c_pad - n_classes))).astype(jnp.bfloat16)  # (H, CPAD)
    b1_2d = b1.reshape(1, H).astype(jnp.float32)
    b2_2d = jnp.pad(b2, (0, c_pad - n_classes)).reshape(1, c_pad).astype(jnp.float32)

    grid = (n_pad // tm,)
    flops = 2 * n_pad * (C * H + H * c_pad)
    bytes_accessed = (2 * (n_pad * C + C * H + H * c_pad)          # bf16 activations + weights
                      + 4 * (H + c_pad + n_pad * c_pad))           # f32 biases + output

    out = pl.pallas_call(
        _cls_head_kernel,
        out_shape=jax.ShapeDtypeStruct((n_pad, c_pad), jnp.float32),
        grid_spec=pltpu.PrefetchScalarGridSpec(
            num_scalar_prefetch=0,
            grid=grid,
            in_specs=[
                pl.BlockSpec((tm, C), lambda i: (i, 0)),       # batch-tiled pooled acts
                pl.BlockSpec((C, H), lambda i: (0, 0)),        # weights: block idx constant
                pl.BlockSpec((1, H), lambda i: (0, 0)),        #   -> stay VMEM-resident
                pl.BlockSpec((H, c_pad), lambda i: (0, 0)),
                pl.BlockSpec((1, c_pad), lambda i: (0, 0)),
            ],
            out_specs=pl.BlockSpec((tm, c_pad), lambda i: (i, 0)),
        ),
        compiler_params=pltpu.CompilerParams(
            dimension_semantics=("parallel",)),
        cost_estimate=pl.CostEstimate(
            flops=flops,
            transcendentals=2 * n_pad * c_pad,
            bytes_accessed=bytes_accessed),
    )(pooled_bf, w1_t, b1_2d, w2_t, b2_2d)

    return out[:N, :n_classes]


def _reference(x, w1, b1, w2, b2):
    pooled = jnp.max(x, axis=-1)                                   # AdaptiveMaxPool1d(1) + flatten
    h = jnp.maximum(pooled @ w1.T + b1, 0.0)                       # fc1 + ReLU
    z = h @ w2.T + b2                                              # fc2
    return jax.nn.sigmoid(z)


if __name__ == "__main__":
    # Classification_Head(n_classes=7): fc1 is Linear(1280, 512) so the pooled
    # feature dim (= channel dim of the input) must be 1280.
    N, C, L = 2, 1280, 16
    H, n_classes = 512, 7

    key = jax.random.PRNGKey(0)
    kx, kw1, kb1, kw2, kb2 = jax.random.split(key, 5)

    x = jax.random.normal(kx, (N, C, L), dtype=jnp.float32)

    # nn.Linear default init: U(-1/sqrt(fan_in), 1/sqrt(fan_in)) for weight & bias.
    bound1 = 1.0 / jnp.sqrt(C)
    w1 = jax.random.uniform(kw1, (H, C), minval=-bound1, maxval=bound1, dtype=jnp.float32)
    b1 = jax.random.uniform(kb1, (H,), minval=-bound1, maxval=bound1, dtype=jnp.float32)
    bound2 = 1.0 / jnp.sqrt(H)
    w2 = jax.random.uniform(kw2, (n_classes, H), minval=-bound2, maxval=bound2, dtype=jnp.float32)
    b2 = jax.random.uniform(kb2, (n_classes,), minval=-bound2, maxval=bound2, dtype=jnp.float32)

    out = classification_head_forward(x, w1, b1, w2, b2)
    out = jax.block_until_ready(out)

    ref = _reference(x, w1, b1, w2, b2)
    assert out.shape == (N, n_classes), out.shape
    # Tolerance covers bf16 dot inputs (f32 accumulation) and the approximate
    # EUP reciprocal; observed post-sigmoid error is a few e-3 max.
    assert jnp.allclose(out, ref, atol=1e-2, rtol=1e-2), float(jnp.abs(out - ref).max())

    print("KERNEL_OK")
</pallas_src>

<mosaic_0001>
module attributes {stable_mosaic.version = 11 : i64} {
  func.func @_cls_head_kernel(%arg0: i32, %arg1: memref<128x1280xbf16, #tpu.memory_space<vmem>>, %arg2: memref<1280x512xbf16, #tpu.memory_space<vmem>>, %arg3: memref<1x512xf32, #tpu.memory_space<vmem>>, %arg4: memref<512x128xbf16, #tpu.memory_space<vmem>>, %arg5: memref<1x128xf32, #tpu.memory_space<vmem>>, %arg6: memref<128x128xf32, #tpu.memory_space<vmem>>) attributes {dimension_semantics = [#tpu.dimension_semantics<parallel>], iteration_bounds = array<i64: 1>, scalar_prefetch = 0 : i64, scratch_operands = 0 : i64, tpu.core_type = #tpu.core_type<tc>, window_params = [{transform_indices = @transform_0, window_bounds = array<i64: 128, 1280>}, {pipeline_mode = #tpu.pipeline_mode<synchronous>, transform_indices = @transform_1, window_bounds = array<i64: 1280, 512>}, {pipeline_mode = #tpu.pipeline_mode<synchronous>, transform_indices = @transform_2, window_bounds = array<i64: 1, 512>}, {pipeline_mode = #tpu.pipeline_mode<synchronous>, transform_indices = @transform_3, window_bounds = array<i64: 512, 128>}, {pipeline_mode = #tpu.pipeline_mode<synchronous>, transform_indices = @transform_4, window_bounds = array<i64: 1, 128>}, {transform_indices = @transform_5, window_bounds = array<i64: 128, 128>}]} {
    %c0 = arith.constant 0 : index
    %c0_0 = arith.constant 0 : index
    %0 = vector.load %arg1[%c0, %c0_0] : memref<128x1280xbf16, #tpu.memory_space<vmem>>, vector<128x1280xbf16>
    %c0_1 = arith.constant 0 : index
    %c0_2 = arith.constant 0 : index
    %1 = vector.load %arg2[%c0_1, %c0_2] : memref<1280x512xbf16, #tpu.memory_space<vmem>>, vector<1280x512xbf16>
    %cst = arith.constant dense<0.000000e+00> : vector<128x512xf32>
    %2 = tpu.matmul %0, %1, %cst {dimension_numbers = #tpu.dot_dimension_numbers<[1], [0], [0], [1], [0, 0, 1, 1], [], []>} : vector<128x1280xbf16>, vector<1280x512xbf16>, vector<128x512xf32> -> vector<128x512xf32>
    %c0_3 = arith.constant 0 : index
    %c0_4 = arith.constant 0 : index
    %3 = vector.load %arg3[%c0_3, %c0_4] : memref<1x512xf32, #tpu.memory_space<vmem>>, vector<1x512xf32>
    %4 = vector.broadcast %3 : vector<1x512xf32> to vector<128x512xf32>
    %5 = arith.addf %2, %4 : vector<128x512xf32>
    %cst_5 = arith.constant 0.000000e+00 : f32
    %6 = vector.broadcast %cst_5 : f32 to vector<128x512xf32>
    %7 = arith.maximumf %5, %6 : vector<128x512xf32>
    %8 = arith.truncf %7 : vector<128x512xf32> to vector<128x512xbf16>
    %c0_6 = arith.constant 0 : index
    %c0_7 = arith.constant 0 : index
    %9 = vector.load %arg4[%c0_6, %c0_7] : memref<512x128xbf16, #tpu.memory_space<vmem>>, vector<512x128xbf16>
    %cst_8 = arith.constant dense<0.000000e+00> : vector<128x128xf32>
    %10 = tpu.matmul %8, %9, %cst_8 {dimension_numbers = #tpu.dot_dimension_numbers<[1], [0], [0], [1], [0, 0, 1, 1], [], []>} : vector<128x512xbf16>, vector<512x128xbf16>, vector<128x128xf32> -> vector<128x128xf32>
    %c0_9 = arith.constant 0 : index
    %c0_10 = arith.constant 0 : index
    %11 = vector.load %arg5[%c0_9, %c0_10] : memref<1x128xf32, #tpu.memory_space<vmem>>, vector<1x128xf32>
    %12 = vector.broadcast %11 : vector<1x128xf32> to vector<128x128xf32>
    %13 = arith.addf %10, %12 : vector<128x128xf32>
    %cst_11 = arith.constant 0.000000e+00 : f32
    %14 = vector.broadcast %cst_11 : f32 to vector<128x128xf32>
    %15 = arith.subf %14, %13 : vector<128x128xf32>
    %16 = math.exp %15 : vector<128x128xf32>
    %cst_12 = arith.constant 1.000000e+00 : f32
    %17 = vector.broadcast %cst_12 : f32 to vector<128x128xf32>
    %18 = arith.addf %17, %16 : vector<128x128xf32>
    %19 = tpu.reciprocal %18 {approx = true} : vector<128x128xf32> -> vector<128x128xf32>
    %c0_13 = arith.constant 0 : index
    %c0_14 = arith.constant 0 : index
    %20 = vector.load %arg6[%c0_13, %c0_14] : memref<128x128xf32, #tpu.memory_space<vmem>>, vector<128x128xf32>
    tpu.vector_store %arg6[%c0_13, %c0_14], %19 {strides = array<i32>} : memref<128x128xf32, #tpu.memory_space<vmem>>, vector<128x128xf32>,
    return
  }
  func.func @transform_0(%arg0: i32) -> (i32, i32) {
    %c0_i32 = arith.constant 0 : i32
    %c0_i32_0 = arith.constant 0 : i32
    return %arg0, %c0_i32 : i32, i32
  }
  func.func @transform_1(%arg0: i32) -> (i32, i32) {
    %c0_i32 = arith.constant 0 : i32
    %c0_i32_0 = arith.constant 0 : i32
    %c0_i32_1 = arith.constant 0 : i32
    return %c0_i32, %c0_i32_0 : i32, i32
  }
  func.func @transform_2(%arg0: i32) -> (i32, i32) {
    %c0_i32 = arith.constant 0 : i32
    %c0_i32_0 = arith.constant 0 : i32
    %c0_i32_1 = arith.constant 0 : i32
    return %c0_i32, %c0_i32_0 : i32, i32
  }
  func.func @transform_3(%arg0: i32) -> (i32, i32) {
    %c0_i32 = arith.constant 0 : i32
    %c0_i32_0 = arith.constant 0 : i32
    %c0_i32_1 = arith.constant 0 : i32
    return %c0_i32, %c0_i32_0 : i32, i32
  }
  func.func @transform_4(%arg0: i32) -> (i32, i32) {
    %c0_i32 = arith.constant 0 : i32
    %c0_i32_0 = arith.constant 0 : i32
    %c0_i32_1 = arith.constant 0 : i32
    return %c0_i32, %c0_i32_0 : i32, i32
  }
  func.func @transform_5(%arg0: i32) -> (i32, i32) {
    %c0_i32 = arith.constant 0 : i32
    %c0_i32_0 = arith.constant 0 : i32
    return %arg0, %c0_i32 : i32, i32
  }
}

</mosaic_0001>

<bundles_post_ra>
// kernel: tpu_custom_call.1
= control target key start
LH: loop header
LB: loop body
LE: loop exit
PB: predicated region body
PF: predicated region fallthrough
CT: control target
= control target key end

     0   :  { %10 = vsyncpa [#allocation3], 0  ;;  %s6243_s0 = inlined_call_operand.hbm [shape: bf16[128,1280], index: 0, kind: input, shape index: {}]   ;;  %s6244_s1 = inlined_call_operand.hbm [shape: bf16[1280,512], index: 1, kind: input, shape index: {}]   ;;  %s6245_s2 = inlined_call_operand.hbm [shape: f32[1,512], index: 2, kind: input, shape index: {}]   ;;  %s6246_s3 = inlined_call_operand.hbm [shape: bf16[512,128], index: 3, kind: input, shape index: {}]   ;;  %s6247_s4 = inlined_call_operand.hbm [shape: f32[1,128], index: 4, kind: input, shape index: {}]   ;;  %s6248_s5 = inlined_call_operand.hbm [shape: f32[128,128], index: 5, kind: output, shape index: {}]  }
   0x1   :  { %11 = vsyncpa [#allocation6], 0 }
   0x2   :  { %12 = vsyncpa [#allocation9], 0 }
   0x3   :  { %13 = vsyncpa [#allocation4], 0  ;;  %s6037_s18 = smov [#allocation5]   ;;  %s5897_s22 = scalar_lea.hbm %s6244_s1, 40960 }
   0x4   :  { %s31_s19 = sshll.u32 %s6037_s18, 4  ;;  %p5898_p0 = scmp.ne.s32.totalorder %s6244_s1, %s5897_s22  ;;  %s32_s19 = int_to_ptr.vmem [resolvable:$true] %s31_s19 }
   0x5   :  { %p5901_p1 = scmp.lt.u32.totalorder %s5897_s22, %s6244_s1 }
   0x7   :  { %p5903_p2 = pnand %p5901_p1, %p5898_p0 }
   0x9   :  { %5906 = shalt.err (!%p5903_p2)
}
   0xa   :  { %s5907_s27 = scalar_lea.vmem %s32_s19, 40960  ;;  %p5912_p4 = scmp.lt.s32.totalorder %s32_s19, %s32_s19 }
   0xb   :  { %p5908_p3 = scmp.ne.s32.totalorder %s32_s19, %s5907_s27  ;;  %p5913_p5 = scmp.lt.s32.totalorder %s5907_s27, %s5907_s27 }
   0xd   :  { %p5914_p6 = por %p5913_p5, %p5912_p4 }
   0xf   :  { %p5915_p7 = pnand %p5914_p6, %p5908_p3 }
  0x11   :  { %5918 = shalt.err (!%p5915_p7)
}
  0x12   :  { %s6038_s28 = smov 256   ;;  %s6039_s29 = smov 16  }
  0x13   :  { %37 = dma.hbm_to_vmem [thread:$0]  %s6244_s1, 40960, %s32_s19, [#allocation6], %s6038_s28, %s6038_s28, %s6039_s29  }
  0x14   :  { %s6040_s7 = smov [#allocation8]   ;;  %s5919_s11 = scalar_lea.hbm %s6246_s3, 4096 }
  0x15   :  { %s53_s8 = sshll.u32 %s6040_s7, 4  ;;  %p5920_p8 = scmp.ne.s32.totalorder %s6246_s3, %s5919_s11  ;;  %s54_s8 = int_to_ptr.vmem [resolvable:$true] %s53_s8 }
  0x16   :  { %p5923_p9 = scmp.lt.u32.totalorder %s5919_s11, %s6246_s3 }
  0x18   :  { %p5925_p10 = pnand %p5923_p9, %p5920_p8 }
  0x1a   :  { %5928 = shalt.err (!%p5925_p10)
}
  0x1b   :  { %s5929_s16 = scalar_lea.vmem %s54_s8, 4096  ;;  %p5934_p12 = scmp.lt.s32.totalorder %s54_s8, %s54_s8 }
  0x1c   :  { %p5930_p11 = scmp.ne.s32.totalorder %s54_s8, %s5929_s16  ;;  %p5935_p13 = scmp.lt.s32.totalorder %s5929_s16, %s5929_s16 }
  0x1e   :  { %p5936_p0 = por %p5935_p13, %p5934_p12 }
  0x20   :  { %p5937_p1 = pnand %p5936_p0, %p5930_p11 }
  0x22   :  { %5940 = shalt.err (!%p5937_p1)
}
  0x23   :  { %s6041_s1 = smov 64   ;;  %s6042_s17 = smov 4  }
  0x24   :  { %59 = dma.hbm_to_vmem [thread:$0]  %s6246_s3, 4096, %s54_s8, [#allocation9], %s6041_s1, %s6041_s1, %s6042_s17  }
  0x25   :  { %s6043_s20 = smov [#allocation2]   ;;  %s5941_s24 = scalar_lea.hbm %s6243_s0, 10240 }
  0x26   :  { %s19_s21 = sshll.u32 %s6043_s20, 4  ;;  %p5942_p2 = scmp.ne.s32.totalorder %s6243_s0, %s5941_s24  ;;  %s20_s21 = int_to_ptr.vmem [resolvable:$true] %s19_s21 }
  0x27   :  { %p5945_p3 = scmp.lt.u32.totalorder %s5941_s24, %s6243_s0 }
  0x29   :  { %p5947_p4 = pnand %p5945_p3, %p5942_p2 }
  0x2b   :  { %5950 = shalt.err (!%p5947_p4)
}
  0x2c   :  { %s5951_s29 = scalar_lea.vmem %s20_s21, 10240  ;;  %p5956_p6 = scmp.lt.s32.totalorder %s20_s21, %s20_s21 }
  0x2d   :  { %p5952_p5 = scmp.ne.s32.totalorder %s20_s21, %s5951_s29  ;;  %p5957_p7 = scmp.lt.s32.totalorder %s5951_s29, %s5951_s29 }
  0x2f   :  { %p5958_p8 = por %p5957_p7, %p5956_p6 }
  0x31   :  { %p5959_p9 = pnand %p5958_p8, %p5952_p5 }
  0x33   :  { %5962 = shalt.err (!%p5959_p9)
}
  0x34   :  { %s6044_s3 = smov 640   ;;  %s6045_s30 = smov 40  }
  0x35   :  { %25 = dma.hbm_to_vmem [thread:$0]  %s6243_s0, 10240, %s20_s21, [#allocation3], %s6044_s3, %s6044_s3, %s6045_s30  }
  0x36   :  { %s6046_s8 = smov [#allocation7]   ;;  %s6047_s10 = smov [#allocation10]  }
  0x37   :  { %s44_s9 = sshll.u32 %s6046_s8, 4  ;;  %s66_s11 = sshll.u32 %s6047_s10, 4  ;;  %s45_s9 = int_to_ptr.vmem [resolvable:$true] %s44_s9  ;;  %s67_s11 = int_to_ptr.vmem [resolvable:$true] %s66_s11 }
  0x38   :  { %s5963_s14 = scalar_lea.hbm %s6245_s2, 64 }
  0x39   :  { %p5964_p10 = scmp.ne.s32.totalorder %s6245_s2, %s5963_s14  ;;  %p5967_p11 = scmp.lt.u32.totalorder %s5963_s14, %s6245_s2 }
  0x3b   :  { %p5969_p12 = pnand %p5967_p11, %p5964_p10 }
  0x3d   :  { %5972 = shalt.err (!%p5969_p12)
}
  0x3e   :  { %s5973_s0 = scalar_lea.vmem %s45_s9, 64  ;;  %p5978_p0 = scmp.lt.s32.totalorder %s45_s9, %s45_s9 }
  0x3f   :  { %p5974_p13 = scmp.ne.s32.totalorder %s45_s9, %s5973_s0  ;;  %p5979_p1 = scmp.lt.s32.totalorder %s5973_s0, %s5973_s0 }
  0x41   :  { %p5980_p2 = por %p5979_p1, %p5978_p0 }
  0x43   :  { %p5981_p3 = pnand %p5980_p2, %p5974_p13 }
  0x45   :  { %5984 = shalt.err (!%p5981_p3)
}
  0x46   :  { %47 = dma.hbm_to_vmem [thread:$0]  %s6245_s2, 64, %s45_s9, [#allocation6]  }
  0x47   :  { %s5985_s22 = scalar_lea.hbm %s6247_s4, 16 }
  0x48   :  { %p5986_p4 = scmp.ne.s32.totalorder %s6247_s4, %s5985_s22  ;;  %p5989_p5 = scmp.lt.u32.totalorder %s5985_s22, %s6247_s4 }
  0x4a   :  { %p5991_p6 = pnand %p5989_p5, %p5986_p4 }
  0x4c   :  { %5994 = shalt.err (!%p5991_p6)
}
  0x4d   :  { %s5995_s27 = scalar_lea.vmem %s67_s11, 16  ;;  %s5999_s28 = scalar_lea.vmem %s67_s11, 32 }
  0x4e   :  { %p5996_p7 = scmp.ne.s32.totalorder %s67_s11, %s5995_s27  ;;  %p6000_p8 = scmp.lt.s32.totalorder %s67_s11, %s67_s11 }
  0x4f   :  { %p6001_p9 = scmp.lt.s32.totalorder %s5999_s28, %s5995_s27 }
  0x51   :  { %p6002_p10 = por %p6001_p9, %p6000_p8 }
  0x53   :  { %p6003_p11 = pnand %p6002_p10, %p5996_p7 }
  0x55   :  { %6006 = shalt.err (!%p6003_p11)
}
  0x56   :  { %69 = dma.hbm_to_vmem [thread:$0]  %s6247_s4, 16, %s67_s11, [#allocation9]  }
  0x57   :  { %6029 = dma.done.wait [#allocation3], 10240  }
  0x58   :  { %6030 = vsyncadd [#allocation3], 4294957056 }
  0x59   :  { %6031 = dma.done.wait [#allocation6], 41024  }
  0x5a   :  { %6032 = vsyncadd [#allocation6], 4294926272 }
  0x5b   :  { %6033 = dma.done.wait [#allocation9], 4112  }
  0x5c   :  { %6034 = vsyncadd [#allocation9], 4294963184  ;;  %v5201_v0 = vld [vmem:[#allocation5 + $0x4] ss:$16 sps:$4 sm:$0xff]   ;;  %v5203_v1 = vld [vmem:[#allocation5 + $0xc] ss:$16 sps:$4 sm:$0xff]  }
  0x5d   :  { %2508 = vmatprep.subr.bf16.mxu0 %v5201_v0  ;;  %v5205_v2 = vld [vmem:[#allocation5] ss:$16 sps:$4 sm:$0xff]   ;;  %v5206_v3 = vld [vmem:[#allocation5 + $0x8] ss:$16 sps:$4 sm:$0xff]   ;;  %3073 = vmatprep.subr.bf16.mxu1 %v5203_v1  ;;  %v5207_v4 = vld [vmem:[#allocation5 + $0x24] ss:$16 sps:$4 sm:$0xff]  }
  0x5e   :  { %2509 = vmatpush1.bf16.msra.mxu0 %v5205_v2  ;;  %3074 = vmatpush1.bf16.msra.mxu1 %v5206_v3  ;;  %v5209_v5 = vld [vmem:[#allocation5 + $0x2c] ss:$16 sps:$4 sm:$0xff]   ;;  %v5211_v6 = vld [vmem:[#allocation5 + $0x20] ss:$16 sps:$4 sm:$0xff]   ;;  %v5212_v7 = vld [vmem:[#allocation5 + $0x28] ss:$16 sps:$4 sm:$0xff]  }
  0x5f   :  { %2510 = vmatprep.subr.bf16.mxu0 %v5207_v4  ;;  %3075 = vmatprep.subr.bf16.mxu1 %v5209_v5  ;;  %v5213_v8 = vld [vmem:[#allocation5 + $0x44] ss:$16 sps:$4 sm:$0xff]   ;;  %v5215_v9 = vld [vmem:[#allocation5 + $0x4c] ss:$16 sps:$4 sm:$0xff]   ;;  %v5217_v10 = vld [vmem:[#allocation5 + $0x40] ss:$16 sps:$4 sm:$0xff]  }
  0x60   :  { %v5218_v11 = vld [vmem:[#allocation5 + $0x48] ss:$16 sps:$4 sm:$0xff]   ;;  %v5219_v12 = vld [vmem:[#allocation5 + $0x64] ss:$16 sps:$4 sm:$0xff]   ;;  %v5221_v13 = vld [vmem:[#allocation5 + $0x6c] ss:$16 sps:$4 sm:$0xff]  }
  0x61   :  { %v5223_v14 = vld [vmem:[#allocation5 + $0x60] ss:$16 sps:$4 sm:$0xff]   ;;  %v5224_v15 = vld [vmem:[#allocation5 + $0x68] ss:$16 sps:$4 sm:$0xff]   ;;  %v5225_v16 = vld [vmem:[#allocation5 + $0x84] ss:$16 sps:$4 sm:$0xff]  }
  0x62   :  { %2511 = vmatpush1.bf16.msra.mxu0 %v5211_v6  ;;  %3076 = vmatpush1.bf16.msra.mxu1 %v5212_v7  ;;  %v5227_v17 = vld [vmem:[#allocation5 + $0x8c] ss:$16 sps:$4 sm:$0xff]   ;;  %v5229_v18 = vld [vmem:[#allocation5 + $0x80] ss:$16 sps:$4 sm:$0xff]   ;;  %v5230_v19 = vld [vmem:[#allocation5 + $0x88] ss:$16 sps:$4 sm:$0xff]  }
  0x63   :  { %2512 = vmatprep.subr.bf16.mxu0 %v5213_v8  ;;  %3077 = vmatprep.subr.bf16.mxu1 %v5215_v9  ;;  %v5231_v20 = vld [vmem:[#allocation5 + $0xa4] ss:$16 sps:$4 sm:$0xff]   ;;  %v5233_v21 = vld [vmem:[#allocation5 + $0xac] ss:$16 sps:$4 sm:$0xff]   ;;  %v5235_v22 = vld [vmem:[#allocation5 + $0xa0] ss:$16 sps:$4 sm:$0xff]  }
  0x64   :  { %v5236_v23 = vld [vmem:[#allocation5 + $0xa8] ss:$16 sps:$4 sm:$0xff]   ;;  %v5237_v24 = vld [vmem:[#allocation5 + $0xc4] ss:$16 sps:$4 sm:$0xff]   ;;  %v5239_v25 = vld [vmem:[#allocation5 + $0xcc] ss:$16 sps:$4 sm:$0xff]  }
  0x65   :  { %v5241_v26 = vld [vmem:[#allocation5 + $0xc0] ss:$16 sps:$4 sm:$0xff]   ;;  %v5242_v27 = vld [vmem:[#allocation5 + $0xc8] ss:$16 sps:$4 sm:$0xff]   ;;  %v5243_v28 = vld [vmem:[#allocation5 + $0xe4] ss:$16 sps:$4 sm:$0xff]  }
  0x66   :  { %2513 = vmatpush1.bf16.msra.mxu0 %v5217_v10  ;;  %3078 = vmatpush1.bf16.msra.mxu1 %v5218_v11  ;;  %v5245_v29 = vld [vmem:[#allocation5 + $0xec] ss:$16 sps:$4 sm:$0xff]   ;;  %v5247_v30 = vld [vmem:[#allocation5 + $0xe0] ss:$16 sps:$4 sm:$0xff]   ;;  %v5248_v31 = vld [vmem:[#allocation5 + $0xe8] ss:$16 sps:$4 sm:$0xff]  }
  0x67   :  { %2514 = vmatprep.subr.bf16.mxu0 %v5219_v12  ;;  %3079 = vmatprep.subr.bf16.mxu1 %v5221_v13  ;;  %v5249_v32 = vld [vmem:[#allocation5 + $0x104] ss:$16 sps:$4 sm:$0xff]   ;;  %v5251_v33 = vld [vmem:[#allocation5 + $0x10c] ss:$16 sps:$4 sm:$0xff]   ;;  %v5253_v34 = vld [vmem:[#allocation5 + $0x100] ss:$16 sps:$4 sm:$0xff]  }
  0x68   :  { %v5254_v35 = vld [vmem:[#allocation5 + $0x108] ss:$16 sps:$4 sm:$0xff]   ;;  %v5255_v36 = vld [vmem:[#allocation5 + $0x124] ss:$16 sps:$4 sm:$0xff]   ;;  %v5257_v37 = vld [vmem:[#allocation5 + $0x12c] ss:$16 sps:$4 sm:$0xff]  }
  0x69   :  { %v5259_v38 = vld [vmem:[#allocation5 + $0x120] ss:$16 sps:$4 sm:$0xff]   ;;  %v5260_v39 = vld [vmem:[#allocation5 + $0x128] ss:$16 sps:$4 sm:$0xff]   ;;  %v5261_v40 = vld [vmem:[#allocation5 + $0x144] ss:$16 sps:$4 sm:$0xff]  }
  0x6a   :  { %2515 = vmatpush1.bf16.msra.mxu0 %v5223_v14  ;;  %3080 = vmatpush1.bf16.msra.mxu1 %v5224_v15  ;;  %v5263_v41 = vld [vmem:[#allocation5 + $0x14c] ss:$16 sps:$4 sm:$0xff]   ;;  %v5265_v42 = vld [vmem:[#allocation5 + $0x140] ss:$16 sps:$4 sm:$0xff]   ;;  %v5266_v43 = vld [vmem:[#allocation5 + $0x148] ss:$16 sps:$4 sm:$0xff]  }
  0x6b   :  { %2516 = vmatprep.subr.bf16.mxu0 %v5225_v16  ;;  %3081 = vmatprep.subr.bf16.mxu1 %v5227_v17  ;;  %v5267_v44 = vld [vmem:[#allocation5 + $0x164] ss:$16 sps:$4 sm:$0xff]   ;;  %v5269_v45 = vld [vmem:[#allocation5 + $0x16c] ss:$16 sps:$4 sm:$0xff]   ;;  %v5271_v46 = vld [vmem:[#allocation5 + $0x160] ss:$16 sps:$4 sm:$0xff]  }
  0x6c   :  { %v5272_v47 = vld [vmem:[#allocation5 + $0x168] ss:$16 sps:$4 sm:$0xff]   ;;  %v5299_v48 = vld [vmem:[#allocation2 + $0x4] ss:$40 sps:$4 sm:$0xff]   ;;  %v5277_v51 = vld [vmem:[#allocation5 + $0x180] ss:$16 sps:$4 sm:$0xff]  }
  0x6d   :  { %v5273_v49 = vld [vmem:[#allocation5 + $0x184] ss:$16 sps:$4 sm:$0xff]   ;;  %v5275_v50 = vld [vmem:[#allocation5 + $0x18c] ss:$16 sps:$4 sm:$0xff]   ;;  %2540 = vmatprep.mubr.bf16.mxu0 %v5299_v48  ;;  %3105 = vmatprep.mubr.bf16.mxu1 %v5299_v48  ;;  %v5278_v52 = vld [vmem:[#allocation5 + $0x188] ss:$16 sps:$4 sm:$0xff]  }
  0x6e   :  { %2517 = vmatpush1.bf16.msra.mxu0 %v5229_v18  ;;  %3082 = vmatpush1.bf16.msra.mxu1 %v5230_v19  ;;  %v5279_v53 = vld [vmem:[#allocation5 + $0x1a4] ss:$16 sps:$4 sm:$0xff]   ;;  %v5281_v54 = vld [vmem:[#allocation5 + $0x1ac] ss:$16 sps:$4 sm:$0xff]   ;;  %v5283_v55 = vld [vmem:[#allocation5 + $0x1a0] ss:$16 sps:$4 sm:$0xff]  }
  0x6f   :  { %2518 = vmatprep.subr.bf16.mxu0 %v5231_v20  ;;  %3083 = vmatprep.subr.bf16.mxu1 %v5233_v21  ;;  %v5284_v56 = vld [vmem:[#allocation5 + $0x1a8] ss:$16 sps:$4 sm:$0xff]   ;;  %v5285_v57 = vld [vmem:[#allocation5 + $0x1c4] ss:$16 sps:$4 sm:$0xff]   ;;  %v5287_v58 = vld [vmem:[#allocation5 + $0x1cc] ss:$16 sps:$4 sm:$0xff]  }
  0x70   :  { %v5289_v59 = vld [vmem:[#allocation5 + $0x1c0] ss:$16 sps:$4 sm:$0xff]   ;;  %v5290_v60 = vld [vmem:[#allocation5 + $0x1c8] ss:$16 sps:$4 sm:$0xff]   ;;  %v5291_v61 = vld [vmem:[#allocation5 + $0x1e4] ss:$16 sps:$4 sm:$0xff]  }
  0x71   :  { %v5293_v62 = vld [vmem:[#allocation5 + $0x1ec] ss:$16 sps:$4 sm:$0xff]   ;;  %v5295_v63 = vld [vmem:[#allocation5 + $0x1e0] ss:$16 sps:$4 sm:$0xff]   ;;  %v5296_v0 = vld [vmem:[#allocation5 + $0x1e8] ss:$16 sps:$4 sm:$0xff]  }
  0x72   :  { %2519 = vmatpush1.bf16.msra.mxu0 %v5235_v22  ;;  %3084 = vmatpush1.bf16.msra.mxu1 %v5236_v23  ;;  %v5302_v1 = vld [vmem:[#allocation5 + $0x204] ss:$16 sps:$4 sm:$0xff]   ;;  %v5305_v2 = vld [vmem:[#allocation5 + $0x20c] ss:$16 sps:$4 sm:$0xff]   ;;  %v5297_v3 = vld [vmem:[#allocation2] ss:$40 sps:$4 sm:$0xff]  }
  0x73   :  { %2520 = vmatprep.subr.bf16.mxu0 %v5237_v24  ;;  %3085 = vmatprep.subr.bf16.mxu1 %v5239_v25  ;;  %v5300_v4 = vld [vmem:[#allocation5 + $0x200] ss:$16 sps:$4 sm:$0xff]   ;;  %v5303_v5 = vld [vmem:[#allocation5 + $0x208] ss:$16 sps:$4 sm:$0xff]   ;;  %v5308_v6 = vld [vmem:[#allocation5 + $0x224] ss:$16 sps:$4 sm:$0xff]  }
  0x74   :  { %v5311_v7 = vld [vmem:[#allocation5 + $0x22c] ss:$16 sps:$4 sm:$0xff]   ;;  %v5306_v9 = vld [vmem:[#allocation5 + $0x220] ss:$16 sps:$4 sm:$0xff]   ;;  %v5309_v10 = vld [vmem:[#allocation5 + $0x228] ss:$16 sps:$4 sm:$0xff]  }
  0x75   :  { %v5312_v8 = vld [vmem:[#allocation2 + $0x54] ss:$40 sps:$4 sm:$0xff]   ;;  %v5314_v13 = vld [vmem:[#allocation2 + $0x50] ss:$40 sps:$4 sm:$0xff]   ;;  %v5327_v18 = vld [vmem:[#allocation2 + $0xa4] ss:$40 sps:$4 sm:$0xff]  }
  0x76   :  { %2521 = vmatpush1.bf16.msra.mxu0 %v5241_v26  ;;  %3086 = vmatpush1.bf16.msra.mxu1 %v5242_v27  ;;  %v5317_v11 = vld [vmem:[#allocation5 + $0x244] ss:$16 sps:$4 sm:$0xff]   ;;  %v5320_v12 = vld [vmem:[#allocation5 + $0x24c] ss:$16 sps:$4 sm:$0xff]   ;;  %v5315_v14 = vld [vmem:[#allocation5 + $0x240] ss:$16 sps:$4 sm:$0xff]  }
  0x77   :  { %2522 = vmatprep.subr.bf16.mxu0 %v5243_v28  ;;  %3087 = vmatprep.subr.bf16.mxu1 %v5245_v29  ;;  %v5318_v15 = vld [vmem:[#allocation5 + $0x248] ss:$16 sps:$4 sm:$0xff]   ;;  %v5323_v16 = vld [vmem:[#allocation5 + $0x264] ss:$16 sps:$4 sm:$0xff]   ;;  %v5326_v17 = vld [vmem:[#allocation5 + $0x26c] ss:$16 sps:$4 sm:$0xff]  }
  0x78   :  { %v5321_v19 = vld [vmem:[#allocation5 + $0x260] ss:$16 sps:$4 sm:$0xff]   ;;  %v5324_v20 = vld [vmem:[#allocation5 + $0x268] ss:$16 sps:$4 sm:$0xff]   ;;  %v5332_v21 = vld [vmem:[#allocation5 + $0x284] ss:$16 sps:$4 sm:$0xff]  }
  0x79   :  { %v5335_v22 = vld [vmem:[#allocation5 + $0x28c] ss:$16 sps:$4 sm:$0xff]   ;;  %v5329_v23 = vld [vmem:[#allocation2 + $0xa0] ss:$40 sps:$4 sm:$0xff]   ;;  %v5338_v26 = vld [vmem:[#allocation5 + $0x2a4] ss:$16 sps:$4 sm:$0xff]  }
  0x7a   :  { %2523 = vmatpush1.bf16.msra.mxu0 %v5247_v30  ;;  %3088 = vmatpush1.bf16.msra.mxu1 %v5248_v31  ;;  %v5330_v24 = vld [vmem:[#allocation5 + $0x280] ss:$16 sps:$4 sm:$0xff]   ;;  %v5333_v25 = vld [vmem:[#allocation5 + $0x288] ss:$16 sps:$4 sm:$0xff]   ;;  %v5341_v27 = vld [vmem:[#allocation5 + $0x2ac] ss:$16 sps:$4 sm:$0xff]  }
  0x7b   :  { %2524 = vmatprep.subr.bf16.mxu0 %v5249_v32  ;;  %3089 = vmatprep.subr.bf16.mxu1 %v5251_v33  ;;  %v5342_v28 = vld [vmem:[#allocation2 + $0xf4] ss:$40 sps:$4 sm:$0xff]   ;;  %v5336_v29 = vld [vmem:[#allocation5 + $0x2a0] ss:$16 sps:$4 sm:$0xff]   ;;  %v5339_v30 = vld [vmem:[#allocation5 + $0x2a8] ss:$16 sps:$4 sm:$0xff]  }
  0x7c   :  { %v5347_v31 = vld [vmem:[#allocation5 + $0x2c4] ss:$16 sps:$4 sm:$0xff]   ;;  %v5350_v32 = vld [vmem:[#allocation5 + $0x2cc] ss:$16 sps:$4 sm:$0xff]   ;;  %v5344_v33 = vld [vmem:[#allocation2 + $0xf0] ss:$40 sps:$4 sm:$0xff]  }
  0x7d   :  { %v5372_v48 = vld [vmem:[#allocation2 + $0x194] ss:$40 sps:$4 sm:$0xff]   ;;  %s6048_s4 = smov [#allocation11]  }
  0x7e   :  { %2525 = vmatpush1.bf16.msra.mxu0 %v5253_v34  ;;  %3090 = vmatpush1.bf16.msra.mxu1 %v5254_v35  ;;  %v5345_v34 = vld [vmem:[#allocation5 + $0x2c0] ss:$16 sps:$4 sm:$0xff]   ;;  %v5348_v35 = vld [vmem:[#allocation5 + $0x2c8] ss:$16 sps:$4 sm:$0xff]   ;;  %s4292_s3 = sshll.u32 %s6048_s4, 4  ;;  %s4293_s3 = int_to_ptr.vmem [resolvable:$true] %s4292_s3 }
  0x7f   :  { %2526 = vmatprep.subr.bf16.mxu0 %v5255_v36  ;;  %3091 = vmatprep.subr.bf16.mxu1 %v5257_v37  ;;  %v5353_v36 = vld [vmem:[#allocation5 + $0x2e4] ss:$16 sps:$4 sm:$0xff]   ;;  %v5356_v37 = vld [vmem:[#allocation5 + $0x2ec] ss:$16 sps:$4 sm:$0xff]   ;;  %s6007_s30 = scalar_lea.vmem %s4293_s3, 2048  ;;  %p6012_p13 = scmp.lt.s32.totalorder %s4293_s3, %s4293_s3 }
  0x80   :  { %p6008_p12 = scmp.ne.s32.totalorder %s4293_s3, %s6007_s30  ;;  %p6013_p0 = scmp.lt.s32.totalorder %s6007_s30, %s6007_s30 }
  0x82   :  { %2527 = vmatpush1.bf16.msra.mxu0 %v5259_v38  ;;  %3092 = vmatpush1.bf16.msra.mxu1 %v5260_v39  ;;  %v5357_v38 = vld [vmem:[#allocation2 + $0x144] ss:$40 sps:$4 sm:$0xff]   ;;  %v5351_v39 = vld [vmem:[#allocation5 + $0x2e0] ss:$16 sps:$4 sm:$0xff]   ;;  %p6014_p1 = por %p6013_p0, %p6012_p13 }
  0x83   :  { %2528 = vmatprep.subr.bf16.mxu0 %v5261_v40  ;;  %3093 = vmatprep.subr.bf16.mxu1 %v5263_v41  ;;  %v5354_v40 = vld [vmem:[#allocation5 + $0x2e8] ss:$16 sps:$4 sm:$0xff]   ;;  %v5362_v41 = vld [vmem:[#allocation5 + $0x304] ss:$16 sps:$4 sm:$0xff]  }
  0x84   :  { %p6015_p2 = pnand %p6014_p1, %p6008_p12 }
  0x86   :  { %2529 = vmatpush1.bf16.msra.mxu0 %v5265_v42  ;;  %3094 = vmatpush1.bf16.msra.mxu1 %v5266_v43  ;;  %v5365_v42 = vld [vmem:[#allocation5 + $0x30c] ss:$16 sps:$4 sm:$0xff]   ;;  %v5359_v43 = vld [vmem:[#allocation2 + $0x140] ss:$40 sps:$4 sm:$0xff]  }
  0x87   :  { %2530 = vmatprep.subr.bf16.mxu0 %v5267_v44  ;;  %3095 = vmatprep.subr.bf16.mxu1 %v5269_v45  ;;  %v5360_v44 = vld [vmem:[#allocation5 + $0x300] ss:$16 sps:$4 sm:$0xff]   ;;  %v5363_v45 = vld [vmem:[#allocation5 + $0x308] ss:$16 sps:$4 sm:$0xff]  }
  0x8a   :  { %2531 = vmatpush1.bf16.msra.mxu0 %v5271_v46  ;;  %3096 = vmatpush1.bf16.msra.mxu1 %v5272_v47  ;;  %v5368_v46 = vld [vmem:[#allocation5 + $0x324] ss:$16 sps:$4 sm:$0xff]   ;;  %v5371_v47 = vld [vmem:[#allocation5 + $0x32c] ss:$16 sps:$4 sm:$0xff]  }
  0x8b   :  { %2532 = vmatprep.subr.bf16.mxu0 %v5273_v49  ;;  %3097 = vmatprep.subr.bf16.mxu1 %v5275_v50  ;;  %v5366_v49 = vld [vmem:[#allocation5 + $0x320] ss:$16 sps:$4 sm:$0xff]   ;;  %v5369_v50 = vld [vmem:[#allocation5 + $0x328] ss:$16 sps:$4 sm:$0xff]  }
  0x8e   :  { %2533 = vmatpush1.bf16.msra.mxu0 %v5277_v51  ;;  %3098 = vmatpush1.bf16.msra.mxu1 %v5278_v52  ;;  %v5377_v51 = vld [vmem:[#allocation5 + $0x344] ss:$16 sps:$4 sm:$0xff]   ;;  %v5380_v52 = vld [vmem:[#allocation5 + $0x34c] ss:$16 sps:$4 sm:$0xff]  }
  0x8f   :  { %2534 = vmatprep.subr.bf16.mxu0 %v5279_v53  ;;  %3099 = vmatprep.subr.bf16.mxu1 %v5281_v54  ;;  %v5374_v53 = vld [vmem:[#allocation2 + $0x190] ss:$40 sps:$4 sm:$0xff]  }
  0x90   :  { %v5375_v54 = vld [vmem:[#allocation5 + $0x340] ss:$16 sps:$4 sm:$0xff]  }
  0x92   :  { %2535 = vmatpush1.bf16.msra.mxu0 %v5283_v55  ;;  %3100 = vmatpush1.bf16.msra.mxu1 %v5284_v56  ;;  %v5378_v55 = vld [vmem:[#allocation5 + $0x348] ss:$16 sps:$4 sm:$0xff]   ;;  %v5383_v56 = vld [vmem:[#allocation5 + $0x364] ss:$16 sps:$4 sm:$0xff]  }
  0x93   :  { %2536 = vmatprep.subr.bf16.mxu0 %v5285_v57  ;;  %3101 = vmatprep.subr.bf16.mxu1 %v5287_v58  ;;  %v5386_v57 = vld [vmem:[#allocation5 + $0x36c] ss:$16 sps:$4 sm:$0xff]  }
  0x94   :  { %v5387_v58 = vld [vmem:[#allocation2 + $0x1e4] ss:$40 sps:$4 sm:$0xff]  }
  0x96   :  { %2537 = vmatpush1.bf16.msra.mxu0 %v5289_v59  ;;  %3102 = vmatpush1.bf16.msra.mxu1 %v5290_v60  ;;  %v5381_v59 = vld [vmem:[#allocation5 + $0x360] ss:$16 sps:$4 sm:$0xff]   ;;  %v5384_v60 = vld [vmem:[#allocation5 + $0x368] ss:$16 sps:$4 sm:$0xff]  }
  0x97   :  { %2538 = vmatprep.subr.bf16.mxu0 %v5291_v61  ;;  %3103 = vmatprep.subr.bf16.mxu1 %v5293_v62  ;;  %v5392_v61 = vld [vmem:[#allocation5 + $0x384] ss:$16 sps:$4 sm:$0xff]   ;;  %v5395_v62 = vld [vmem:[#allocation5 + $0x38c] ss:$16 sps:$4 sm:$0xff]  }
  0x9a   :  { %2539 = vmatpush1.bf16.msra.mxu0 %v5295_v63  ;;  %3104 = vmatpush1.bf16.msra.mxu1 %v5296_v0  ;;  %v5389_v63 = vld [vmem:[#allocation2 + $0x1e0] ss:$40 sps:$4 sm:$0xff]  }
  0x9b   :  { %2621 = vmatprep.subr.bf16.mxu0 %v5302_v1  ;;  %3186 = vmatprep.subr.bf16.mxu1 %v5305_v2  ;;  %v5390_v0 = vld [vmem:[#allocation5 + $0x380] ss:$16 sps:$4 sm:$0xff]   ;;  %v5393_v1 = vld [vmem:[#allocation5 + $0x388] ss:$16 sps:$4 sm:$0xff]   ;;  %v5398_v2 = vld [vmem:[#allocation5 + $0x3a4] ss:$16 sps:$4 sm:$0xff]  }
  0x9d   :  { %2541 = vmatmul.mubr.bf16.vlgmr.msra.gmra.mrb[0].mxu0 %v5297_v3  ;;  %3106 = vmatmul.mubr.bf16.vlgmr.msra.gmra.mrb[0].mxu1 %v5297_v3  ;;  %v5401_v3 = vld [vmem:[#allocation5 + $0x3ac] ss:$16 sps:$4 sm:$0xff]  }
  0x9e   :  { %2622 = vmatpush1.bf16.msra.mxu0 %v5300_v4  ;;  %3187 = vmatpush1.bf16.msra.mxu1 %v5303_v5  ;;  %v5402_v4 = vld [vmem:[#allocation2 + $0x234] ss:$40 sps:$4 sm:$0xff]   ;;  %v5396_v5 = vld [vmem:[#allocation5 + $0x3a0] ss:$16 sps:$4 sm:$0xff]  }
  0x9f   :  { %2623 = vmatprep.subr.bf16.mxu0 %v5308_v6  ;;  %3188 = vmatprep.subr.bf16.mxu1 %v5311_v7  ;;  %v5399_v6 = vld [vmem:[#allocation5 + $0x3a8] ss:$16 sps:$4 sm:$0xff]   ;;  %v5407_v7 = vld [vmem:[#allocation5 + $0x3c4] ss:$16 sps:$4 sm:$0xff]  }
  0xa0   :  { %2550 = vmatprep.mubr.bf16.mxu0 %v5312_v8  ;;  %3115 = vmatprep.mubr.bf16.mxu1 %v5312_v8  ;;  %v5410_v8 = vld [vmem:[#allocation5 + $0x3cc] ss:$16 sps:$4 sm:$0xff]  }
  0xa2   :  { %2624 = vmatpush1.bf16.msra.mxu0 %v5306_v9  ;;  %3189 = vmatpush1.bf16.msra.mxu1 %v5309_v10  ;;  %v5404_v9 = vld [vmem:[#allocation2 + $0x230] ss:$40 sps:$4 sm:$0xff]  }
  0xa3   :  { %2625 = vmatprep.subr.bf16.mxu0 %v5317_v11  ;;  %3190 = vmatprep.subr.bf16.mxu1 %v5320_v12  ;;  %v5405_v10 = vld [vmem:[#allocation5 + $0x3c0] ss:$16 sps:$4 sm:$0xff]   ;;  %v5408_v11 = vld [vmem:[#allocation5 + $0x3c8] ss:$16 sps:$4 sm:$0xff]   ;;  %v5413_v12 = vld [vmem:[#allocation5 + $0x3e4] ss:$16 sps:$4 sm:$0xff]  }
  0xa5   :  { %2551 = vmatmul.mubr.bf16.gmra.mrb[4].mxu0 %v5314_v13  ;;  %3116 = vmatmul.mubr.bf16.gmra.mrb[4].mxu1 %v5314_v13  ;;  %v5416_v13 = vld [vmem:[#allocation5 + $0x3ec] ss:$16 sps:$4 sm:$0xff]  }
  0xa6   :  { %2626 = vmatpush1.bf16.msra.mxu0 %v5315_v14  ;;  %3191 = vmatpush1.bf16.msra.mxu1 %v5318_v15  ;;  %v5419_v14 = vld [vmem:[#allocation2 + $0xc] ss:$40 sps:$4 sm:$0xff]   ;;  %v5411_v15 = vld [vmem:[#allocation5 + $0x3e0] ss:$16 sps:$4 sm:$0xff]  }
  0xa7   :  { %2627 = vmatprep.subr.bf16.mxu0 %v5323_v16  ;;  %3192 = vmatprep.subr.bf16.mxu1 %v5326_v17  ;;  %v5414_v16 = vld [vmem:[#allocation5 + $0x3e8] ss:$16 sps:$4 sm:$0xff]   ;;  %v5422_v17 = vld [vmem:[#allocation5 + $0x404] ss:$16 sps:$4 sm:$0xff]  }
  0xa8   :  { %2560 = vmatprep.mubr.bf16.mxu0 %v5327_v18  ;;  %3125 = vmatprep.mubr.bf16.mxu1 %v5327_v18  ;;  %v5425_v18 = vld [vmem:[#allocation5 + $0x40c] ss:$16 sps:$4 sm:$0xff]  }
  0xaa   :  { %2628 = vmatpush1.bf16.msra.mxu0 %v5321_v19  ;;  %3193 = vmatpush1.bf16.msra.mxu1 %v5324_v20  ;;  %v5417_v19 = vld [vmem:[#allocation2 + $0x8] ss:$40 sps:$4 sm:$0xff]  }
  0xab   :  { %2629 = vmatprep.subr.bf16.mxu0 %v5332_v21  ;;  %3194 = vmatprep.subr.bf16.mxu1 %v5335_v22  ;;  %v5420_v20 = vld [vmem:[#allocation5 + $0x400] ss:$16 sps:$4 sm:$0xff]   ;;  %v5423_v21 = vld [vmem:[#allocation5 + $0x408] ss:$16 sps:$4 sm:$0xff]   ;;  %v5428_v22 = vld [vmem:[#allocation5 + $0x424] ss:$16 sps:$4 sm:$0xff]  }
  0xad   :  { %2561 = vmatmul.mubr.bf16.gmra.mrb[8].mxu0 %v5329_v23  ;;  %3126 = vmatmul.mubr.bf16.gmra.mrb[8].mxu1 %v5329_v23  ;;  %v5431_v23 = vld [vmem:[#allocation5 + $0x42c] ss:$16 sps:$4 sm:$0xff]  }
  0xae   :  { %2630 = vmatpush1.bf16.msra.mxu0 %v5330_v24  ;;  %3195 = vmatpush1.bf16.msra.mxu1 %v5333_v25  ;;  %v5432_v24 = vld [vmem:[#allocation2 + $0x5c] ss:$40 sps:$4 sm:$0xff]   ;;  %v5426_v25 = vld [vmem:[#allocation5 + $0x420] ss:$16 sps:$4 sm:$0xff]  }
  0xaf   :  { %2631 = vmatprep.subr.bf16.mxu0 %v5338_v26  ;;  %3196 = vmatprep.subr.bf16.mxu1 %v5341_v27  ;;  %v5429_v26 = vld [vmem:[#allocation5 + $0x428] ss:$16 sps:$4 sm:$0xff]   ;;  %v5437_v27 = vld [vmem:[#allocation5 + $0x444] ss:$16 sps:$4 sm:$0xff]  }
  0xb0   :  { %2570 = vmatprep.mubr.bf16.mxu0 %v5342_v28  ;;  %3135 = vmatprep.mubr.bf16.mxu1 %v5342_v28  ;;  %v5440_v28 = vld [vmem:[#allocation5 + $0x44c] ss:$16 sps:$4 sm:$0xff]  }
  0xb2   :  { %2632 = vmatpush1.bf16.msra.mxu0 %v5336_v29  ;;  %3197 = vmatpush1.bf16.msra.mxu1 %v5339_v30  ;;  %v5434_v29 = vld [vmem:[#allocation2 + $0x58] ss:$40 sps:$4 sm:$0xff]  }
  0xb3   :  { %2633 = vmatprep.subr.bf16.mxu0 %v5347_v31  ;;  %3198 = vmatprep.subr.bf16.mxu1 %v5350_v32  ;;  %v5435_v30 = vld [vmem:[#allocation5 + $0x440] ss:$16 sps:$4 sm:$0xff]   ;;  %v5438_v31 = vld [vmem:[#allocation5 + $0x448] ss:$16 sps:$4 sm:$0xff]   ;;  %v5443_v32 = vld [vmem:[#allocation5 + $0x464] ss:$16 sps:$4 sm:$0xff]  }
  0xb5   :  { %2571 = vmatmul.mubr.bf16.gmra.mrb[12].mxu0 %v5344_v33  ;;  %3136 = vmatmul.mubr.bf16.gmra.mrb[12].mxu1 %v5344_v33  ;;  %v5446_v33 = vld [vmem:[#allocation5 + $0x46c] ss:$16 sps:$4 sm:$0xff]  }
  0xb6   :  { %2634 = vmatpush1.bf16.msra.mxu0 %v5345_v34  ;;  %3199 = vmatpush1.bf16.msra.mxu1 %v5348_v35  ;;  %v5447_v34 = vld [vmem:[#allocation2 + $0xac] ss:$40 sps:$4 sm:$0xff]   ;;  %v5441_v35 = vld [vmem:[#allocation5 + $0x460] ss:$16 sps:$4 sm:$0xff]  }
  0xb7   :  { %2635 = vmatprep.subr.bf16.mxu0 %v5353_v36  ;;  %3200 = vmatprep.subr.bf16.mxu1 %v5356_v37  ;;  %v5444_v36 = vld [vmem:[#allocation5 + $0x468] ss:$16 sps:$4 sm:$0xff]   ;;  %v5452_v37 = vld [vmem:[#allocation5 + $0x484] ss:$16 sps:$4 sm:$0xff]  }
  0xb8   :  { %2580 = vmatprep.mubr.bf16.mxu0 %v5357_v38  ;;  %3145 = vmatprep.mubr.bf16.mxu1 %v5357_v38  ;;  %v5455_v38 = vld [vmem:[#allocation5 + $0x48c] ss:$16 sps:$4 sm:$0xff]  }
  0xba   :  { %2636 = vmatpush1.bf16.msra.mxu0 %v5351_v39  ;;  %3201 = vmatpush1.bf16.msra.mxu1 %v5354_v40  ;;  %v5449_v39 = vld [vmem:[#allocation2 + $0xa8] ss:$40 sps:$4 sm:$0xff]  }
  0xbb   :  { %2637 = vmatprep.subr.bf16.mxu0 %v5362_v41  ;;  %3202 = vmatprep.subr.bf16.mxu1 %v5365_v42  ;;  %v5450_v40 = vld [vmem:[#allocation5 + $0x480] ss:$16 sps:$4 sm:$0xff]   ;;  %v5453_v41 = vld [vmem:[#allocation5 + $0x488] ss:$16 sps:$4 sm:$0xff]   ;;  %v5458_v42 = vld [vmem:[#allocation5 + $0x4a4] ss:$16 sps:$4 sm:$0xff]  }
  0xbd   :  { %2581 = vmatmul.mubr.bf16.gmra.mrb[16].mxu0 %v5359_v43  ;;  %3146 = vmatmul.mubr.bf16.gmra.mrb[16].mxu1 %v5359_v43  ;;  %v5461_v43 = vld [vmem:[#allocation5 + $0x4ac] ss:$16 sps:$4 sm:$0xff]  }
  0xbe   :  { %2638 = vmatpush1.bf16.msra.mxu0 %v5360_v44  ;;  %3203 = vmatpush1.bf16.msra.mxu1 %v5363_v45  ;;  %v5462_v44 = vld [vmem:[#allocation2 + $0xfc] ss:$40 sps:$4 sm:$0xff]   ;;  %v5456_v45 = vld [vmem:[#allocation5 + $0x4a0] ss:$16 sps:$4 sm:$0xff]  }
  0xbf   :  { %2639 = vmatprep.subr.bf16.mxu0 %v5368_v46  ;;  %3204 = vmatprep.subr.bf16.mxu1 %v5371_v47  ;;  %v5459_v46 = vld [vmem:[#allocation5 + $0x4a8] ss:$16 sps:$4 sm:$0xff]   ;;  %v5467_v47 = vld [vmem:[#allocation5 + $0x4c4] ss:$16 sps:$4 sm:$0xff]  }
  0xc0   :  { %2590 = vmatprep.mubr.bf16.mxu0 %v5372_v48  ;;  %3155 = vmatprep.mubr.bf16.mxu1 %v5372_v48  ;;  %v5470_v48 = vld [vmem:[#allocation5 + $0x4cc] ss:$16 sps:$4 sm:$0xff]  }
  0xc2   :  { %2640 = vmatpush1.bf16.msra.mxu0 %v5366_v49  ;;  %3205 = vmatpush1.bf16.msra.mxu1 %v5369_v50  ;;  %v5464_v49 = vld [vmem:[#allocation2 + $0xf8] ss:$40 sps:$4 sm:$0xff]  }
  0xc3   :  { %2641 = vmatprep.subr.bf16.mxu0 %v5377_v51  ;;  %3206 = vmatprep.subr.bf16.mxu1 %v5380_v52  ;;  %v5465_v50 = vld [vmem:[#allocation5 + $0x4c0] ss:$16 sps:$4 sm:$0xff]   ;;  %v5468_v51 = vld [vmem:[#allocation5 + $0x4c8] ss:$16 sps:$4 sm:$0xff]   ;;  %v5473_v52 = vld [vmem:[#allocation5 + $0x4e4] ss:$16 sps:$4 sm:$0xff]  }
  0xc5   :  { %2591 = vmatmul.mubr.bf16.gmra.mrb[20].mxu0 %v5374_v53  ;;  %3156 = vmatmul.mubr.bf16.gmra.mrb[20].mxu1 %v5374_v53  ;;  %v5476_v53 = vld [vmem:[#allocation5 + $0x4ec] ss:$16 sps:$4 sm:$0xff]  }
  0xc6   :  { %2642 = vmatpush1.bf16.msra.mxu0 %v5375_v54  ;;  %3207 = vmatpush1.bf16.msra.mxu1 %v5378_v55  ;;  %v5477_v54 = vld [vmem:[#allocation2 + $0x14c] ss:$40 sps:$4 sm:$0xff]   ;;  %v5471_v55 = vld [vmem:[#allocation5 + $0x4e0] ss:$16 sps:$4 sm:$0xff]  }
  0xc7   :  { %2643 = vmatprep.subr.bf16.mxu0 %v5383_v56  ;;  %3208 = vmatprep.subr.bf16.mxu1 %v5386_v57  ;;  %v5474_v56 = vld [vmem:[#allocation5 + $0x4e8] ss:$16 sps:$4 sm:$0xff]   ;;  %v5482_v57 = vld [vmem:[#allocation5 + $0x504] ss:$16 sps:$4 sm:$0xff]  }
  0xc8   :  { %2600 = vmatprep.mubr.bf16.mxu0 %v5387_v58  ;;  %3165 = vmatprep.mubr.bf16.mxu1 %v5387_v58  ;;  %v5485_v58 = vld [vmem:[#allocation5 + $0x50c] ss:$16 sps:$4 sm:$0xff]  }
  0xca   :  { %2644 = vmatpush1.bf16.msra.mxu0 %v5381_v59  ;;  %3209 = vmatpush1.bf16.msra.mxu1 %v5384_v60  ;;  %v5479_v59 = vld [vmem:[#allocation2 + $0x148] ss:$40 sps:$4 sm:$0xff]  }
  0xcb   :  { %2645 = vmatprep.subr.bf16.mxu0 %v5392_v61  ;;  %3210 = vmatprep.subr.bf16.mxu1 %v5395_v62  ;;  %v5480_v60 = vld [vmem:[#allocation5 + $0x500] ss:$16 sps:$4 sm:$0xff]   ;;  %v5483_v61 = vld [vmem:[#allocation5 + $0x508] ss:$16 sps:$4 sm:$0xff]   ;;  %v5488_v62 = vld [vmem:[#allocation5 + $0x524] ss:$16 sps:$4 sm:$0xff]  }
  0xcd   :  { %2601 = vmatmul.mubr.bf16.gmra.mrb[24].mxu0 %v5389_v63  ;;  %3166 = vmatmul.mubr.bf16.gmra.mrb[24].mxu1 %v5389_v63  ;;  %v5491_v63 = vld [vmem:[#allocation5 + $0x52c] ss:$16 sps:$4 sm:$0xff]  }
  0xce   :  { %2646 = vmatpush1.bf16.msra.mxu0 %v5390_v0  ;;  %3211 = vmatpush1.bf16.msra.mxu1 %v5393_v1  ;;  %v5492_v0 = vld [vmem:[#allocation2 + $0x19c] ss:$40 sps:$4 sm:$0xff]   ;;  %v5486_v1 = vld [vmem:[#allocation5 + $0x520] ss:$16 sps:$4 sm:$0xff]  }
  0xcf   :  { %2647 = vmatprep.subr.bf16.mxu0 %v5398_v2  ;;  %3212 = vmatprep.subr.bf16.mxu1 %v5401_v3  ;;  %v5489_v2 = vld [vmem:[#allocation5 + $0x528] ss:$16 sps:$4 sm:$0xff]   ;;  %v5497_v3 = vld [vmem:[#allocation5 + $0x544] ss:$16 sps:$4 sm:$0xff]  }
  0xd0   :  { %2610 = vmatprep.mubr.bf16.mxu0 %v5402_v4  ;;  %3175 = vmatprep.mubr.bf16.mxu1 %v5402_v4  ;;  %v5500_v4 = vld [vmem:[#allocation5 + $0x54c] ss:$16 sps:$4 sm:$0xff]  }
  0xd2   :  { %2648 = vmatpush1.bf16.msra.mxu0 %v5396_v5  ;;  %3213 = vmatpush1.bf16.msra.mxu1 %v5399_v6  ;;  %v5494_v5 = vld [vmem:[#allocation2 + $0x198] ss:$40 sps:$4 sm:$0xff]  }
  0xd3   :  { %2649 = vmatprep.subr.bf16.mxu0 %v5407_v7  ;;  %3214 = vmatprep.subr.bf16.mxu1 %v5410_v8  ;;  %v5495_v6 = vld [vmem:[#allocation5 + $0x540] ss:$16 sps:$4 sm:$0xff]   ;;  %v5498_v7 = vld [vmem:[#allocation5 + $0x548] ss:$16 sps:$4 sm:$0xff]   ;;  %v5503_v8 = vld [vmem:[#allocation5 + $0x564] ss:$16 sps:$4 sm:$0xff]  }
  0xd5   :  { %2611 = vmatmul.mubr.bf16.gmra.mrb[28].mxu0 %v5404_v9  ;;  %3176 = vmatmul.mubr.bf16.gmra.mrb[28].mxu1 %v5404_v9  ;;  %v5506_v9 = vld [vmem:[#allocation5 + $0x56c] ss:$16 sps:$4 sm:$0xff]  }
  0xd6   :  { %2650 = vmatpush1.bf16.msra.mxu0 %v5405_v10  ;;  %3215 = vmatpush1.bf16.msra.mxu1 %v5408_v11  ;;  %v5507_v10 = vld [vmem:[#allocation2 + $0x1ec] ss:$40 sps:$4 sm:$0xff]   ;;  %v5501_v11 = vld [vmem:[#allocation5 + $0x560] ss:$16 sps:$4 sm:$0xff]  }
  0xd7   :  { %2651 = vmatprep.subr.bf16.mxu0 %v5413_v12  ;;  %3216 = vmatprep.subr.bf16.mxu1 %v5416_v13  ;;  %v5504_v12 = vld [vmem:[#allocation5 + $0x568] ss:$16 sps:$4 sm:$0xff]   ;;  %v5512_v13 = vld [vmem:[#allocation5 + $0x584] ss:$16 sps:$4 sm:$0xff]  }
  0xd8   :  { %2653 = vmatprep.mubr.bf16.mxu0 %v5419_v14  ;;  %3218 = vmatprep.mubr.bf16.mxu1 %v5419_v14  ;;  %v5515_v14 = vld [vmem:[#allocation5 + $0x58c] ss:$16 sps:$4 sm:$0xff]  }
  0xda   :  { %2652 = vmatpush1.bf16.msra.mxu0 %v5411_v15  ;;  %3217 = vmatpush1.bf16.msra.mxu1 %v5414_v16  ;;  %v5509_v15 = vld [vmem:[#allocation2 + $0x1e8] ss:$40 sps:$4 sm:$0xff]  }
  0xdb   :  { %2734 = vmatprep.subr.bf16.mxu0 %v5422_v17  ;;  %3299 = vmatprep.subr.bf16.mxu1 %v5425_v18  ;;  %v5510_v16 = vld [vmem:[#allocation5 + $0x580] ss:$16 sps:$4 sm:$0xff]   ;;  %v5513_v17 = vld [vmem:[#allocation5 + $0x588] ss:$16 sps:$4 sm:$0xff]   ;;  %v5518_v18 = vld [vmem:[#allocation5 + $0x5a4] ss:$16 sps:$4 sm:$0xff]  }
  0xdd   :  { %2654 = vmatmul.mubr.bf16.vlgmr.msra.gmra.mrb[0].mxu0 %v5417_v19  ;;  %3219 = vmatmul.mubr.bf16.vlgmr.msra.gmra.mrb[0].mxu1 %v5417_v19  ;;  %v5521_v19 = vld [vmem:[#allocation5 + $0x5ac] ss:$16 sps:$4 sm:$0xff]  }
  0xde   :  { %2735 = vmatpush1.bf16.msra.mxu0 %v5420_v20  ;;  %3300 = vmatpush1.bf16.msra.mxu1 %v5423_v21  ;;  %v5522_v20 = vld [vmem:[#allocation2 + $0x23c] ss:$40 sps:$4 sm:$0xff]   ;;  %v5516_v21 = vld [vmem:[#allocation5 + $0x5a0] ss:$16 sps:$4 sm:$0xff]  }
  0xdf   :  { %2736 = vmatprep.subr.bf16.mxu0 %v5428_v22  ;;  %3301 = vmatprep.subr.bf16.mxu1 %v5431_v23  ;;  %v5519_v22 = vld [vmem:[#allocation5 + $0x5a8] ss:$16 sps:$4 sm:$0xff]   ;;  %v5527_v23 = vld [vmem:[#allocation5 + $0x5c4] ss:$16 sps:$4 sm:$0xff]  }
  0xe0   :  { %2663 = vmatprep.mubr.bf16.mxu0 %v5432_v24  ;;  %3228 = vmatprep.mubr.bf16.mxu1 %v5432_v24  ;;  %v5530_v24 = vld [vmem:[#allocation5 + $0x5cc] ss:$16 sps:$4 sm:$0xff]  }
  0xe2   :  { %2737 = vmatpush1.bf16.msra.mxu0 %v5426_v25  ;;  %3302 = vmatpush1.bf16.msra.mxu1 %v5429_v26  ;;  %v5524_v25 = vld [vmem:[#allocation2 + $0x238] ss:$40 sps:$4 sm:$0xff]  }
  0xe3   :  { %2738 = vmatprep.subr.bf16.mxu0 %v5437_v27  ;;  %3303 = vmatprep.subr.bf16.mxu1 %v5440_v28  ;;  %v5525_v26 = vld [vmem:[#allocation5 + $0x5c0] ss:$16 sps:$4 sm:$0xff]   ;;  %v5528_v27 = vld [vmem:[#allocation5 + $0x5c8] ss:$16 sps:$4 sm:$0xff]   ;;  %v5533_v28 = vld [vmem:[#allocation5 + $0x5e4] ss:$16 sps:$4 sm:$0xff]  }
  0xe5   :  { %2664 = vmatmul.mubr.bf16.gmra.mrb[4].mxu0 %v5434_v29  ;;  %3229 = vmatmul.mubr.bf16.gmra.mrb[4].mxu1 %v5434_v29  ;;  %v5536_v29 = vld [vmem:[#allocation5 + $0x5ec] ss:$16 sps:$4 sm:$0xff]  }
  0xe6   :  { %2739 = vmatpush1.bf16.msra.mxu0 %v5435_v30  ;;  %3304 = vmatpush1.bf16.msra.mxu1 %v5438_v31  ;;  %v5539_v30 = vld [vmem:[#allocation2 + $0x14] ss:$40 sps:$4 sm:$0xff]   ;;  %v5531_v31 = vld [vmem:[#allocation5 + $0x5e0] ss:$16 sps:$4 sm:$0xff]  }
  0xe7   :  { %2740 = vmatprep.subr.bf16.mxu0 %v5443_v32  ;;  %3305 = vmatprep.subr.bf16.mxu1 %v5446_v33  ;;  %v5534_v32 = vld [vmem:[#allocation5 + $0x5e8] ss:$16 sps:$4 sm:$0xff]   ;;  %v5542_v33 = vld [vmem:[#allocation5 + $0x604] ss:$16 sps:$4 sm:$0xff]  }
  0xe8   :  { %2673 = vmatprep.mubr.bf16.mxu0 %v5447_v34  ;;  %3238 = vmatprep.mubr.bf16.mxu1 %v5447_v34  ;;  %v5545_v34 = vld [vmem:[#allocation5 + $0x60c] ss:$16 sps:$4 sm:$0xff]  }
  0xea   :  { %2741 = vmatpush1.bf16.msra.mxu0 %v5441_v35  ;;  %3306 = vmatpush1.bf16.msra.mxu1 %v5444_v36  ;;  %v5537_v35 = vld [vmem:[#allocation2 + $0x10] ss:$40 sps:$4 sm:$0xff]  }
  0xeb   :  { %2742 = vmatprep.subr.bf16.mxu0 %v5452_v37  ;;  %3307 = vmatprep.subr.bf16.mxu1 %v5455_v38  ;;  %v5540_v36 = vld [vmem:[#allocation5 + $0x600] ss:$16 sps:$4 sm:$0xff]   ;;  %v5543_v37 = vld [vmem:[#allocation5 + $0x608] ss:$16 sps:$4 sm:$0xff]   ;;  %v5548_v38 = vld [vmem:[#allocation5 + $0x624] ss:$16 sps:$4 sm:$0xff]  }
  0xed   :  { %2674 = vmatmul.mubr.bf16.gmra.mrb[8].mxu0 %v5449_v39  ;;  %3239 = vmatmul.mubr.bf16.gmra.mrb[8].mxu1 %v5449_v39  ;;  %v5551_v39 = vld [vmem:[#allocation5 + $0x62c] ss:$16 sps:$4 sm:$0xff]  }
  0xee   :  { %2743 = vmatpush1.bf16.msra.mxu0 %v5450_v40  ;;  %3308 = vmatpush1.bf16.msra.mxu1 %v5453_v41  ;;  %v5552_v40 = vld [vmem:[#allocation2 + $0x64] ss:$40 sps:$4 sm:$0xff]   ;;  %v5546_v41 = vld [vmem:[#allocation5 + $0x620] ss:$16 sps:$4 sm:$0xff]  }
  0xef   :  { %2744 = vmatprep.subr.bf16.mxu0 %v5458_v42  ;;  %3309 = vmatprep.subr.bf16.mxu1 %v5461_v43  ;;  %v5549_v42 = vld [vmem:[#allocation5 + $0x628] ss:$16 sps:$4 sm:$0xff]   ;;  %v5557_v43 = vld [vmem:[#allocation5 + $0x644] ss:$16 sps:$4 sm:$0xff]  }
  0xf0   :  { %2683 = vmatprep.mubr.bf16.mxu0 %v5462_v44  ;;  %3248 = vmatprep.mubr.bf16.mxu1 %v5462_v44  ;;  %v5560_v44 = vld [vmem:[#allocation5 + $0x64c] ss:$16 sps:$4 sm:$0xff]  }
  0xf2   :  { %2745 = vmatpush1.bf16.msra.mxu0 %v5456_v45  ;;  %3310 = vmatpush1.bf16.msra.mxu1 %v5459_v46  ;;  %v5554_v45 = vld [vmem:[#allocation2 + $0x60] ss:$40 sps:$4 sm:$0xff]  }
  0xf3   :  { %2746 = vmatprep.subr.bf16.mxu0 %v5467_v47  ;;  %3311 = vmatprep.subr.bf16.mxu1 %v5470_v48  ;;  %v5555_v46 = vld [vmem:[#allocation5 + $0x640] ss:$16 sps:$4 sm:$0xff]   ;;  %v5558_v47 = vld [vmem:[#allocation5 + $0x648] ss:$16 sps:$4 sm:$0xff]   ;;  %v5563_v48 = vld [vmem:[#allocation5 + $0x664] ss:$16 sps:$4 sm:$0xff]  }
  0xf5   :  { %2684 = vmatmul.mubr.bf16.gmra.mrb[12].mxu0 %v5464_v49  ;;  %3249 = vmatmul.mubr.bf16.gmra.mrb[12].mxu1 %v5464_v49  ;;  %v5566_v49 = vld [vmem:[#allocation5 + $0x66c] ss:$16 sps:$4 sm:$0xff]  }
  0xf6   :  { %2747 = vmatpush1.bf16.msra.mxu0 %v5465_v50  ;;  %3312 = vmatpush1.bf16.msra.mxu1 %v5468_v51  ;;  %v5567_v50 = vld [vmem:[#allocation2 + $0xb4] ss:$40 sps:$4 sm:$0xff]   ;;  %v5561_v51 = vld [vmem:[#allocation5 + $0x660] ss:$16 sps:$4 sm:$0xff]  }
  0xf7   :  { %2748 = vmatprep.subr.bf16.mxu0 %v5473_v52  ;;  %3313 = vmatprep.subr.bf16.mxu1 %v5476_v53  ;;  %v5564_v52 = vld [vmem:[#allocation5 + $0x668] ss:$16 sps:$4 sm:$0xff]   ;;  %v5572_v53 = vld [vmem:[#allocation5 + $0x684] ss:$16 sps:$4 sm:$0xff]  }
  0xf8   :  { %2693 = vmatprep.mubr.bf16.mxu0 %v5477_v54  ;;  %3258 = vmatprep.mubr.bf16.mxu1 %v5477_v54  ;;  %v5575_v54 = vld [vmem:[#allocation5 + $0x68c] ss:$16 sps:$4 sm:$0xff]  }
  0xfa   :  { %2749 = vmatpush1.bf16.msra.mxu0 %v5471_v55  ;;  %3314 = vmatpush1.bf16.msra.mxu1 %v5474_v56  ;;  %v5569_v55 = vld [vmem:[#allocation2 + $0xb0] ss:$40 sps:$4 sm:$0xff]  }
  0xfb   :  { %2750 = vmatprep.subr.bf16.mxu0 %v5482_v57  ;;  %3315 = vmatprep.subr.bf16.mxu1 %v5485_v58  ;;  %v5570_v56 = vld [vmem:[#allocation5 + $0x680] ss:$16 sps:$4 sm:$0xff]   ;;  %v5573_v57 = vld [vmem:[#allocation5 + $0x688] ss:$16 sps:$4 sm:$0xff]   ;;  %v5578_v58 = vld [vmem:[#allocation5 + $0x6a4] ss:$16 sps:$4 sm:$0xff]  }
  0xfd   :  { %2694 = vmatmul.mubr.bf16.gmra.mrb[16].mxu0 %v5479_v59  ;;  %3259 = vmatmul.mubr.bf16.gmra.mrb[16].mxu1 %v5479_v59  ;;  %v5581_v59 = vld [vmem:[#allocation5 + $0x6ac] ss:$16 sps:$4 sm:$0xff]  }
  0xfe   :  { %2751 = vmatpush1.bf16.msra.mxu0 %v5480_v60  ;;  %3316 = vmatpush1.bf16.msra.mxu1 %v5483_v61  ;;  %v5582_v60 = vld [vmem:[#allocation2 + $0x104] ss:$40 sps:$4 sm:$0xff]   ;;  %v5576_v61 = vld [vmem:[#allocation5 + $0x6a0] ss:$16 sps:$4 sm:$0xff]  }
  0xff   :  { %2752 = vmatprep.subr.bf16.mxu0 %v5488_v62  ;;  %3317 = vmatprep.subr.bf16.mxu1 %v5491_v63  ;;  %v5579_v62 = vld [vmem:[#allocation5 + $0x6a8] ss:$16 sps:$4 sm:$0xff]   ;;  %v5587_v63 = vld [vmem:[#allocation5 + $0x6c4] ss:$16 sps:$4 sm:$0xff]  }
 0x100   :  { %2703 = vmatprep.mubr.bf16.mxu0 %v5492_v0  ;;  %3268 = vmatprep.mubr.bf16.mxu1 %v5492_v0  ;;  %v5590_v0 = vld [vmem:[#allocation5 + $0x6cc] ss:$16 sps:$4 sm:$0xff]  }
 0x102   :  { %2753 = vmatpush1.bf16.msra.mxu0 %v5486_v1  ;;  %3318 = vmatpush1.bf16.msra.mxu1 %v5489_v2  ;;  %v5584_v1 = vld [vmem:[#allocation2 + $0x100] ss:$40 sps:$4 sm:$0xff]  }
 0x103   :  { %2754 = vmatprep.subr.bf16.mxu0 %v5497_v3  ;;  %3319 = vmatprep.subr.bf16.mxu1 %v5500_v4  ;;  %v5585_v2 = vld [vmem:[#allocation5 + $0x6c0] ss:$16 sps:$4 sm:$0xff]   ;;  %v5588_v3 = vld [vmem:[#allocation5 + $0x6c8] ss:$16 sps:$4 sm:$0xff]   ;;  %v5593_v4 = vld [vmem:[#allocation5 + $0x6e4] ss:$16 sps:$4 sm:$0xff]  }
 0x105   :  { %2704 = vmatmul.mubr.bf16.gmra.mrb[20].mxu0 %v5494_v5  ;;  %3269 = vmatmul.mubr.bf16.gmra.mrb[20].mxu1 %v5494_v5  ;;  %v5596_v5 = vld [vmem:[#allocation5 + $0x6ec] ss:$16 sps:$4 sm:$0xff]  }
 0x106   :  { %2755 = vmatpush1.bf16.msra.mxu0 %v5495_v6  ;;  %3320 = vmatpush1.bf16.msra.mxu1 %v5498_v7  ;;  %v5597_v6 = vld [vmem:[#allocation2 + $0x154] ss:$40 sps:$4 sm:$0xff]   ;;  %v5591_v7 = vld [vmem:[#allocation5 + $0x6e0] ss:$16 sps:$4 sm:$0xff]  }
 0x107   :  { %2756 = vmatprep.subr.bf16.mxu0 %v5503_v8  ;;  %3321 = vmatprep.subr.bf16.mxu1 %v5506_v9  ;;  %v5594_v8 = vld [vmem:[#allocation5 + $0x6e8] ss:$16 sps:$4 sm:$0xff]   ;;  %v5602_v9 = vld [vmem:[#allocation5 + $0x704] ss:$16 sps:$4 sm:$0xff]  }
 0x108   :  { %2713 = vmatprep.mubr.bf16.mxu0 %v5507_v10  ;;  %3278 = vmatprep.mubr.bf16.mxu1 %v5507_v10  ;;  %v5605_v10 = vld [vmem:[#allocation5 + $0x70c] ss:$16 sps:$4 sm:$0xff]  }
 0x10a   :  { %2757 = vmatpush1.bf16.msra.mxu0 %v5501_v11  ;;  %3322 = vmatpush1.bf16.msra.mxu1 %v5504_v12  ;;  %v5599_v11 = vld [vmem:[#allocation2 + $0x150] ss:$40 sps:$4 sm:$0xff]  }
 0x10b   :  { %2758 = vmatprep.subr.bf16.mxu0 %v5512_v13  ;;  %3323 = vmatprep.subr.bf16.mxu1 %v5515_v14  ;;  %v5600_v12 = vld [vmem:[#allocation5 + $0x700] ss:$16 sps:$4 sm:$0xff]   ;;  %v5603_v13 = vld [vmem:[#allocation5 + $0x708] ss:$16 sps:$4 sm:$0xff]   ;;  %v5608_v14 = vld [vmem:[#allocation5 + $0x724] ss:$16 sps:$4 sm:$0xff]  }
 0x10d   :  { %2714 = vmatmul.mubr.bf16.gmra.mrb[24].mxu0 %v5509_v15  ;;  %3279 = vmatmul.mubr.bf16.gmra.mrb[24].mxu1 %v5509_v15  ;;  %v5611_v15 = vld [vmem:[#allocation5 + $0x72c] ss:$16 sps:$4 sm:$0xff]  }
 0x10e   :  { %2759 = vmatpush1.bf16.msra.mxu0 %v5510_v16  ;;  %3324 = vmatpush1.bf16.msra.mxu1 %v5513_v17  ;;  %v5612_v16 = vld [vmem:[#allocation2 + $0x1a4] ss:$40 sps:$4 sm:$0xff]   ;;  %v5606_v17 = vld [vmem:[#allocation5 + $0x720] ss:$16 sps:$4 sm:$0xff]  }
 0x10f   :  { %2760 = vmatprep.subr.bf16.mxu0 %v5518_v18  ;;  %3325 = vmatprep.subr.bf16.mxu1 %v5521_v19  ;;  %v5609_v18 = vld [vmem:[#allocation5 + $0x728] ss:$16 sps:$4 sm:$0xff]   ;;  %v5617_v19 = vld [vmem:[#allocation5 + $0x744] ss:$16 sps:$4 sm:$0xff]  }
 0x110   :  { %2723 = vmatprep.mubr.bf16.mxu0 %v5522_v20  ;;  %3288 = vmatprep.mubr.bf16.mxu1 %v5522_v20  ;;  %v5620_v20 = vld [vmem:[#allocation5 + $0x74c] ss:$16 sps:$4 sm:$0xff]  }
 0x112   :  { %2761 = vmatpush1.bf16.msra.mxu0 %v5516_v21  ;;  %3326 = vmatpush1.bf16.msra.mxu1 %v5519_v22  ;;  %v5614_v21 = vld [vmem:[#allocation2 + $0x1a0] ss:$40 sps:$4 sm:$0xff]  }
 0x113   :  { %2762 = vmatprep.subr.bf16.mxu0 %v5527_v23  ;;  %3327 = vmatprep.subr.bf16.mxu1 %v5530_v24  ;;  %v5615_v22 = vld [vmem:[#allocation5 + $0x740] ss:$16 sps:$4 sm:$0xff]   ;;  %v5618_v23 = vld [vmem:[#allocation5 + $0x748] ss:$16 sps:$4 sm:$0xff]   ;;  %v5623_v24 = vld [vmem:[#allocation5 + $0x764] ss:$16 sps:$4 sm:$0xff]  }
 0x115   :  { %2724 = vmatmul.mubr.bf16.gmra.mrb[28].mxu0 %v5524_v25  ;;  %3289 = vmatmul.mubr.bf16.gmra.mrb[28].mxu1 %v5524_v25  ;;  %v5626_v25 = vld [vmem:[#allocation5 + $0x76c] ss:$16 sps:$4 sm:$0xff]  }
 0x116   :  { %2763 = vmatpush1.bf16.msra.mxu0 %v5525_v26  ;;  %3328 = vmatpush1.bf16.msra.mxu1 %v5528_v27  ;;  %v5627_v26 = vld [vmem:[#allocation2 + $0x1f4] ss:$40 sps:$4 sm:$0xff]   ;;  %v5621_v27 = vld [vmem:[#allocation5 + $0x760] ss:$16 sps:$4 sm:$0xff]  }
 0x117   :  { %2764 = vmatprep.subr.bf16.mxu0 %v5533_v28  ;;  %3329 = vmatprep.subr.bf16.mxu1 %v5536_v29  ;;  %v5624_v28 = vld [vmem:[#allocation5 + $0x768] ss:$16 sps:$4 sm:$0xff]   ;;  %v5632_v29 = vld [vmem:[#allocation5 + $0x784] ss:$16 sps:$4 sm:$0xff]  }
 0x118   :  { %2766 = vmatprep.mubr.bf16.mxu0 %v5539_v30  ;;  %3331 = vmatprep.mubr.bf16.mxu1 %v5539_v30  ;;  %v5635_v30 = vld [vmem:[#allocation5 + $0x78c] ss:$16 sps:$4 sm:$0xff]  }
 0x11a   :  { %2765 = vmatpush1.bf16.msra.mxu0 %v5531_v31  ;;  %3330 = vmatpush1.bf16.msra.mxu1 %v5534_v32  ;;  %v5629_v31 = vld [vmem:[#allocation2 + $0x1f0] ss:$40 sps:$4 sm:$0xff]  }
 0x11b   :  { %2847 = vmatprep.subr.bf16.mxu0 %v5542_v33  ;;  %3412 = vmatprep.subr.bf16.mxu1 %v5545_v34  ;;  %v5630_v32 = vld [vmem:[#allocation5 + $0x780] ss:$16 sps:$4 sm:$0xff]   ;;  %v5633_v33 = vld [vmem:[#allocation5 + $0x788] ss:$16 sps:$4 sm:$0xff]   ;;  %v5638_v34 = vld [vmem:[#allocation5 + $0x7a4] ss:$16 sps:$4 sm:$0xff]  }
 0x11d   :  { %2767 = vmatmul.mubr.bf16.vlgmr.msra.gmra.mrb[0].mxu0 %v5537_v35  ;;  %3332 = vmatmul.mubr.bf16.vlgmr.msra.gmra.mrb[0].mxu1 %v5537_v35  ;;  %v5641_v35 = vld [vmem:[#allocation5 + $0x7ac] ss:$16 sps:$4 sm:$0xff]  }
 0x11e   :  { %2848 = vmatpush1.bf16.msra.mxu0 %v5540_v36  ;;  %3413 = vmatpush1.bf16.msra.mxu1 %v5543_v37  ;;  %v5642_v36 = vld [vmem:[#allocation2 + $0x244] ss:$40 sps:$4 sm:$0xff]   ;;  %v5636_v37 = vld [vmem:[#allocation5 + $0x7a0] ss:$16 sps:$4 sm:$0xff]  }
 0x11f   :  { %2849 = vmatprep.subr.bf16.mxu0 %v5548_v38  ;;  %3414 = vmatprep.subr.bf16.mxu1 %v5551_v39  ;;  %v5639_v38 = vld [vmem:[#allocation5 + $0x7a8] ss:$16 sps:$4 sm:$0xff]   ;;  %v5647_v39 = vld [vmem:[#allocation5 + $0x7c4] ss:$16 sps:$4 sm:$0xff]  }
 0x120   :  { %2776 = vmatprep.mubr.bf16.mxu0 %v5552_v40  ;;  %3341 = vmatprep.mubr.bf16.mxu1 %v5552_v40  ;;  %v5650_v40 = vld [vmem:[#allocation5 + $0x7cc] ss:$16 sps:$4 sm:$0xff]  }
 0x122   :  { %2850 = vmatpush1.bf16.msra.mxu0 %v5546_v41  ;;  %3415 = vmatpush1.bf16.msra.mxu1 %v5549_v42  ;;  %v5644_v41 = vld [vmem:[#allocation2 + $0x240] ss:$40 sps:$4 sm:$0xff]  }
 0x123   :  { %2851 = vmatprep.subr.bf16.mxu0 %v5557_v43  ;;  %3416 = vmatprep.subr.bf16.mxu1 %v5560_v44  ;;  %v5645_v42 = vld [vmem:[#allocation5 + $0x7c0] ss:$16 sps:$4 sm:$0xff]   ;;  %v5648_v43 = vld [vmem:[#allocation5 + $0x7c8] ss:$16 sps:$4 sm:$0xff]   ;;  %v5653_v44 = vld [vmem:[#allocation5 + $0x7e4] ss:$16 sps:$4 sm:$0xff]  }
 0x125   :  { %2777 = vmatmul.mubr.bf16.gmra.mrb[4].mxu0 %v5554_v45  ;;  %3342 = vmatmul.mubr.bf16.gmra.mrb[4].mxu1 %v5554_v45  ;;  %v5656_v45 = vld [vmem:[#allocation5 + $0x7ec] ss:$16 sps:$4 sm:$0xff]  }
 0x126   :  { %2852 = vmatpush1.bf16.msra.mxu0 %v5555_v46  ;;  %3417 = vmatpush1.bf16.msra.mxu1 %v5558_v47  ;;  %v5659_v46 = vld [vmem:[#allocation2 + $0x1c] ss:$40 sps:$4 sm:$0xff]   ;;  %v5651_v47 = vld [vmem:[#allocation5 + $0x7e0] ss:$16 sps:$4 sm:$0xff]  }
 0x127   :  { %2853 = vmatprep.subr.bf16.mxu0 %v5563_v48  ;;  %3418 = vmatprep.subr.bf16.mxu1 %v5566_v49  ;;  %v5654_v48 = vld [vmem:[#allocation5 + $0x7e8] ss:$16 sps:$4 sm:$0xff]   ;;  %v5662_v49 = vld [vmem:[#allocation5 + $0x804] ss:$16 sps:$4 sm:$0xff]  }
 0x128   :  { %2786 = vmatprep.mubr.bf16.mxu0 %v5567_v50  ;;  %3351 = vmatprep.mubr.bf16.mxu1 %v5567_v50  ;;  %v5665_v50 = vld [vmem:[#allocation5 + $0x80c] ss:$16 sps:$4 sm:$0xff]  }
 0x12a   :  { %2854 = vmatpush1.bf16.msra.mxu0 %v5561_v51  ;;  %3419 = vmatpush1.bf16.msra.mxu1 %v5564_v52  ;;  %v5657_v51 = vld [vmem:[#allocation2 + $0x18] ss:$40 sps:$4 sm:$0xff]  }
 0x12b   :  { %2855 = vmatprep.subr.bf16.mxu0 %v5572_v53  ;;  %3420 = vmatprep.subr.bf16.mxu1 %v5575_v54  ;;  %v5660_v52 = vld [vmem:[#allocation5 + $0x800] ss:$16 sps:$4 sm:$0xff]   ;;  %v5663_v53 = vld [vmem:[#allocation5 + $0x808] ss:$16 sps:$4 sm:$0xff]   ;;  %v5668_v54 = vld [vmem:[#allocation5 + $0x824] ss:$16 sps:$4 sm:$0xff]  }
 0x12d   :  { %2787 = vmatmul.mubr.bf16.gmra.mrb[8].mxu0 %v5569_v55  ;;  %3352 = vmatmul.mubr.bf16.gmra.mrb[8].mxu1 %v5569_v55  ;;  %v5671_v55 = vld [vmem:[#allocation5 + $0x82c] ss:$16 sps:$4 sm:$0xff]  }
 0x12e   :  { %2856 = vmatpush1.bf16.msra.mxu0 %v5570_v56  ;;  %3421 = vmatpush1.bf16.msra.mxu1 %v5573_v57  ;;  %v5672_v56 = vld [vmem:[#allocation2 + $0x6c] ss:$40 sps:$4 sm:$0xff]   ;;  %v5666_v57 = vld [vmem:[#allocation5 + $0x820] ss:$16 sps:$4 sm:$0xff]  }
 0x12f   :  { %2857 = vmatprep.subr.bf16.mxu0 %v5578_v58  ;;  %3422 = vmatprep.subr.bf16.mxu1 %v5581_v59  ;;  %v5669_v58 = vld [vmem:[#allocation5 + $0x828] ss:$16 sps:$4 sm:$0xff]   ;;  %v5677_v59 = vld [vmem:[#allocation5 + $0x844] ss:$16 sps:$4 sm:$0xff]  }
 0x130   :  { %2796 = vmatprep.mubr.bf16.mxu0 %v5582_v60  ;;  %3361 = vmatprep.mubr.bf16.mxu1 %v5582_v60  ;;  %v5680_v60 = vld [vmem:[#allocation5 + $0x84c] ss:$16 sps:$4 sm:$0xff]  }
 0x132   :  { %2858 = vmatpush1.bf16.msra.mxu0 %v5576_v61  ;;  %3423 = vmatpush1.bf16.msra.mxu1 %v5579_v62  ;;  %v5674_v61 = vld [vmem:[#allocation2 + $0x68] ss:$40 sps:$4 sm:$0xff]  }
 0x133   :  { %2859 = vmatprep.subr.bf16.mxu0 %v5587_v63  ;;  %3424 = vmatprep.subr.bf16.mxu1 %v5590_v0  ;;  %v5675_v62 = vld [vmem:[#allocation5 + $0x840] ss:$16 sps:$4 sm:$0xff]   ;;  %v5678_v63 = vld [vmem:[#allocation5 + $0x848] ss:$16 sps:$4 sm:$0xff]   ;;  %v5683_v0 = vld [vmem:[#allocation5 + $0x864] ss:$16 sps:$4 sm:$0xff]  }
 0x135   :  { %2797 = vmatmul.mubr.bf16.gmra.mrb[12].mxu0 %v5584_v1  ;;  %3362 = vmatmul.mubr.bf16.gmra.mrb[12].mxu1 %v5584_v1  ;;  %v5686_v1 = vld [vmem:[#allocation5 + $0x86c] ss:$16 sps:$4 sm:$0xff]  }
 0x136   :  { %2860 = vmatpush1.bf16.msra.mxu0 %v5585_v2  ;;  %3425 = vmatpush1.bf16.msra.mxu1 %v5588_v3  ;;  %v5681_v2 = vld [vmem:[#allocation5 + $0x860] ss:$16 sps:$4 sm:$0xff]   ;;  %v5687_v3 = vld [vmem:[#allocation2 + $0xbc] ss:$40 sps:$4 sm:$0xff]  }
 0x137   :  { %2861 = vmatprep.subr.bf16.mxu0 %v5593_v4  ;;  %3426 = vmatprep.subr.bf16.mxu1 %v5596_v5  ;;  %v5684_v4 = vld [vmem:[#allocation5 + $0x868] ss:$16 sps:$4 sm:$0xff]   ;;  %v5692_v5 = vld [vmem:[#allocation5 + $0x884] ss:$16 sps:$4 sm:$0xff]  }
 0x138   :  { %2806 = vmatprep.mubr.bf16.mxu0 %v5597_v6  ;;  %3371 = vmatprep.mubr.bf16.mxu1 %v5597_v6  ;;  %v5689_v6 = vld [vmem:[#allocation2 + $0xb8] ss:$40 sps:$4 sm:$0xff]  }
 0x13a   :  { %2862 = vmatpush1.bf16.msra.mxu0 %v5591_v7  ;;  %3427 = vmatpush1.bf16.msra.mxu1 %v5594_v8  ;;  %v5695_v7 = vld [vmem:[#allocation5 + $0x88c] ss:$16 sps:$4 sm:$0xff]   ;;  %v5690_v8 = vld [vmem:[#allocation5 + $0x880] ss:$16 sps:$4 sm:$0xff]  }
 0x13b   :  { %2863 = vmatprep.subr.bf16.mxu0 %v5602_v9  ;;  %3428 = vmatprep.subr.bf16.mxu1 %v5605_v10  ;;  %v5693_v9 = vld [vmem:[#allocation5 + $0x888] ss:$16 sps:$4 sm:$0xff]   ;;  %v5698_v10 = vld [vmem:[#allocation5 + $0x8a4] ss:$16 sps:$4 sm:$0xff]  }
 0x13d   :  { %2807 = vmatmul.mubr.bf16.gmra.mrb[16].mxu0 %v5599_v11  ;;  %3372 = vmatmul.mubr.bf16.gmra.mrb[16].mxu1 %v5599_v11  ;;  %v5701_v11 = vld [vmem:[#allocation5 + $0x8ac] ss:$16 sps:$4 sm:$0xff]  }
 0x13e   :  { %2864 = vmatpush1.bf16.msra.mxu0 %v5600_v12  ;;  %3429 = vmatpush1.bf16.msra.mxu1 %v5603_v13  ;;  %v5696_v12 = vld [vmem:[#allocation5 + $0x8a0] ss:$16 sps:$4 sm:$0xff]   ;;  %v5702_v13 = vld [vmem:[#allocation2 + $0x10c] ss:$40 sps:$4 sm:$0xff]  }
 0x13f   :  { %2865 = vmatprep.subr.bf16.mxu0 %v5608_v14  ;;  %3430 = vmatprep.subr.bf16.mxu1 %v5611_v15  ;;  %v5699_v14 = vld [vmem:[#allocation5 + $0x8a8] ss:$16 sps:$4 sm:$0xff]   ;;  %v5707_v15 = vld [vmem:[#allocation5 + $0x8c4] ss:$16 sps:$4 sm:$0xff]  }
 0x140   :  { %2816 = vmatprep.mubr.bf16.mxu0 %v5612_v16  ;;  %3381 = vmatprep.mubr.bf16.mxu1 %v5612_v16  ;;  %v5704_v16 = vld [vmem:[#allocation2 + $0x108] ss:$40 sps:$4 sm:$0xff]  }
 0x142   :  { %2866 = vmatpush1.bf16.msra.mxu0 %v5606_v17  ;;  %3431 = vmatpush1.bf16.msra.mxu1 %v5609_v18  ;;  %v5710_v17 = vld [vmem:[#allocation5 + $0x8cc] ss:$16 sps:$4 sm:$0xff]   ;;  %v5705_v18 = vld [vmem:[#allocation5 + $0x8c0] ss:$16 sps:$4 sm:$0xff]  }
 0x143   :  { %2867 = vmatprep.subr.bf16.mxu0 %v5617_v19  ;;  %3432 = vmatprep.subr.bf16.mxu1 %v5620_v20  ;;  %v5708_v19 = vld [vmem:[#allocation5 + $0x8c8] ss:$16 sps:$4 sm:$0xff]   ;;  %v5713_v20 = vld [vmem:[#allocation5 + $0x8e4] ss:$16 sps:$4 sm:$0xff]  }
 0x145   :  { %2817 = vmatmul.mubr.bf16.gmra.mrb[20].mxu0 %v5614_v21  ;;  %3382 = vmatmul.mubr.bf16.gmra.mrb[20].mxu1 %v5614_v21  ;;  %v5716_v21 = vld [vmem:[#allocation5 + $0x8ec] ss:$16 sps:$4 sm:$0xff]  }
 0x146   :  { %2868 = vmatpush1.bf16.msra.mxu0 %v5615_v22  ;;  %3433 = vmatpush1.bf16.msra.mxu1 %v5618_v23  ;;  %v5711_v22 = vld [vmem:[#allocation5 + $0x8e0] ss:$16 sps:$4 sm:$0xff]   ;;  %v5717_v23 = vld [vmem:[#allocation2 + $0x15c] ss:$40 sps:$4 sm:$0xff]  }
 0x147   :  { %2869 = vmatprep.subr.bf16.mxu0 %v5623_v24  ;;  %3434 = vmatprep.subr.bf16.mxu1 %v5626_v25  ;;  %v5714_v24 = vld [vmem:[#allocation5 + $0x8e8] ss:$16 sps:$4 sm:$0xff]   ;;  %v5722_v25 = vld [vmem:[#allocation5 + $0x904] ss:$16 sps:$4 sm:$0xff]  }
 0x148   :  { %2826 = vmatprep.mubr.bf16.mxu0 %v5627_v26  ;;  %3391 = vmatprep.mubr.bf16.mxu1 %v5627_v26  ;;  %v5719_v26 = vld [vmem:[#allocation2 + $0x158] ss:$40 sps:$4 sm:$0xff]  }
 0x14a   :  { %2870 = vmatpush1.bf16.msra.mxu0 %v5621_v27  ;;  %3435 = vmatpush1.bf16.msra.mxu1 %v5624_v28  ;;  %v5725_v27 = vld [vmem:[#allocation5 + $0x90c] ss:$16 sps:$4 sm:$0xff]   ;;  %v5720_v28 = vld [vmem:[#allocation5 + $0x900] ss:$16 sps:$4 sm:$0xff]  }
 0x14b   :  { %2871 = vmatprep.subr.bf16.mxu0 %v5632_v29  ;;  %3436 = vmatprep.subr.bf16.mxu1 %v5635_v30  ;;  %v5723_v29 = vld [vmem:[#allocation5 + $0x908] ss:$16 sps:$4 sm:$0xff]   ;;  %v5728_v30 = vld [vmem:[#allocation5 + $0x924] ss:$16 sps:$4 sm:$0xff]  }
 0x14d   :  { %2827 = vmatmul.mubr.bf16.gmra.mrb[24].mxu0 %v5629_v31  ;;  %3392 = vmatmul.mubr.bf16.gmra.mrb[24].mxu1 %v5629_v31  ;;  %v5731_v31 = vld [vmem:[#allocation5 + $0x92c] ss:$16 sps:$4 sm:$0xff]  }
 0x14e   :  { %2872 = vmatpush1.bf16.msra.mxu0 %v5630_v32  ;;  %3437 = vmatpush1.bf16.msra.mxu1 %v5633_v33  ;;  %v5726_v32 = vld [vmem:[#allocation5 + $0x920] ss:$16 sps:$4 sm:$0xff]   ;;  %v5732_v33 = vld [vmem:[#allocation2 + $0x1ac] ss:$40 sps:$4 sm:$0xff]  }
 0x14f   :  { %2873 = vmatprep.subr.bf16.mxu0 %v5638_v34  ;;  %3438 = vmatprep.subr.bf16.mxu1 %v5641_v35  ;;  %v5729_v34 = vld [vmem:[#allocation5 + $0x928] ss:$16 sps:$4 sm:$0xff]   ;;  %v5737_v35 = vld [vmem:[#allocation5 + $0x944] ss:$16 sps:$4 sm:$0xff]  }
 0x150   :  { %2836 = vmatprep.mubr.bf16.mxu0 %v5642_v36  ;;  %3401 = vmatprep.mubr.bf16.mxu1 %v5642_v36  ;;  %v5734_v36 = vld [vmem:[#allocation2 + $0x1a8] ss:$40 sps:$4 sm:$0xff]  }
 0x152   :  { %2874 = vmatpush1.bf16.msra.mxu0 %v5636_v37  ;;  %3439 = vmatpush1.bf16.msra.mxu1 %v5639_v38  ;;  %v5740_v37 = vld [vmem:[#allocation5 + $0x94c] ss:$16 sps:$4 sm:$0xff]   ;;  %v5735_v38 = vld [vmem:[#allocation5 + $0x940] ss:$16 sps:$4 sm:$0xff]  }
 0x153   :  { %2875 = vmatprep.subr.bf16.mxu0 %v5647_v39  ;;  %3440 = vmatprep.subr.bf16.mxu1 %v5650_v40  ;;  %v5738_v39 = vld [vmem:[#allocation5 + $0x948] ss:$16 sps:$4 sm:$0xff]   ;;  %v5743_v40 = vld [vmem:[#allocation5 + $0x964] ss:$16 sps:$4 sm:$0xff]  }
 0x155   :  { %2837 = vmatmul.mubr.bf16.gmra.mrb[28].mxu0 %v5644_v41  ;;  %3402 = vmatmul.mubr.bf16.gmra.mrb[28].mxu1 %v5644_v41  ;;  %v5746_v41 = vld [vmem:[#allocation5 + $0x96c] ss:$16 sps:$4 sm:$0xff]  }
 0x156   :  { %2876 = vmatpush1.bf16.msra.mxu0 %v5645_v42  ;;  %3441 = vmatpush1.bf16.msra.mxu1 %v5648_v43  ;;  %v5747_v42 = vld [vmem:[#allocation2 + $0x1fc] ss:$40 sps:$4 sm:$0xff]   ;;  %v5741_v43 = vld [vmem:[#allocation5 + $0x960] ss:$16 sps:$4 sm:$0xff]  }
 0x157   :  { %2877 = vmatprep.subr.bf16.mxu0 %v5653_v44  ;;  %3442 = vmatprep.subr.bf16.mxu1 %v5656_v45  ;;  %v5744_v44 = vld [vmem:[#allocation5 + $0x968] ss:$16 sps:$4 sm:$0xff]   ;;  %v5752_v45 = vld [vmem:[#allocation5 + $0x984] ss:$16 sps:$4 sm:$0xff]  }
 0x158   :  { %2879 = vmatprep.mubr.bf16.mxu0 %v5659_v46  ;;  %3444 = vmatprep.mubr.bf16.mxu1 %v5659_v46  ;;  %v5755_v46 = vld [vmem:[#allocation5 + $0x98c] ss:$16 sps:$4 sm:$0xff]  }
 0x15a   :  { %2878 = vmatpush1.bf16.msra.mxu0 %v5651_v47  ;;  %3443 = vmatpush1.bf16.msra.mxu1 %v5654_v48  ;;  %v5749_v47 = vld [vmem:[#allocation2 + $0x1f8] ss:$40 sps:$4 sm:$0xff]  }
 0x15b   :  { %2960 = vmatprep.subr.bf16.mxu0 %v5662_v49  ;;  %3525 = vmatprep.subr.bf16.mxu1 %v5665_v50  ;;  %v5750_v48 = vld [vmem:[#allocation5 + $0x980] ss:$16 sps:$4 sm:$0xff]   ;;  %v5753_v49 = vld [vmem:[#allocation5 + $0x988] ss:$16 sps:$4 sm:$0xff]   ;;  %v5758_v50 = vld [vmem:[#allocation5 + $0x9a4] ss:$16 sps:$4 sm:$0xff]  }
 0x15d   :  { %2880 = vmatmul.mubr.bf16.vlgmr.msra.gmra.mrb[0].mxu0 %v5657_v51  ;;  %3445 = vmatmul.mubr.bf16.vlgmr.msra.gmra.mrb[0].mxu1 %v5657_v51  ;;  %v5761_v51 = vld [vmem:[#allocation5 + $0x9ac] ss:$16 sps:$4 sm:$0xff]  }
 0x15e   :  { %2961 = vmatpush1.bf16.msra.mxu0 %v5660_v52  ;;  %3526 = vmatpush1.bf16.msra.mxu1 %v5663_v53  ;;  %v5762_v52 = vld [vmem:[#allocation2 + $0x24c] ss:$40 sps:$4 sm:$0xff]   ;;  %v5756_v53 = vld [vmem:[#allocation5 + $0x9a0] ss:$16 sps:$4 sm:$0xff]  }
 0x15f   :  { %2962 = vmatprep.subr.bf16.mxu0 %v5668_v54  ;;  %3527 = vmatprep.subr.bf16.mxu1 %v5671_v55  ;;  %v5759_v54 = vld [vmem:[#allocation5 + $0x9a8] ss:$16 sps:$4 sm:$0xff]   ;;  %v5767_v55 = vld [vmem:[#allocation5 + $0x9c4] ss:$16 sps:$4 sm:$0xff]  }
 0x160   :  { %2889 = vmatprep.mubr.bf16.mxu0 %v5672_v56  ;;  %3454 = vmatprep.mubr.bf16.mxu1 %v5672_v56  ;;  %v5770_v56 = vld [vmem:[#allocation5 + $0x9cc] ss:$16 sps:$4 sm:$0xff]  }
 0x162   :  { %2963 = vmatpush1.bf16.msra.mxu0 %v5666_v57  ;;  %3528 = vmatpush1.bf16.msra.mxu1 %v5669_v58  ;;  %v5764_v57 = vld [vmem:[#allocation2 + $0x248] ss:$40 sps:$4 sm:$0xff]  }
 0x163   :  { %2964 = vmatprep.subr.bf16.mxu0 %v5677_v59  ;;  %3529 = vmatprep.subr.bf16.mxu1 %v5680_v60  ;;  %v5765_v58 = vld [vmem:[#allocation5 + $0x9c0] ss:$16 sps:$4 sm:$0xff]   ;;  %v5768_v59 = vld [vmem:[#allocation5 + $0x9c8] ss:$16 sps:$4 sm:$0xff]   ;;  %v5773_v60 = vld [vmem:[#allocation5 + $0x9e4] ss:$16 sps:$4 sm:$0xff]  }
 0x165   :  { %2890 = vmatmul.mubr.bf16.gmra.mrb[4].mxu0 %v5674_v61  ;;  %3455 = vmatmul.mubr.bf16.gmra.mrb[4].mxu1 %v5674_v61  ;;  %v5776_v61 = vld [vmem:[#allocation5 + $0x9ec] ss:$16 sps:$4 sm:$0xff]  }
 0x166   :  { %2965 = vmatpush1.bf16.msra.mxu0 %v5675_v62  ;;  %3530 = vmatpush1.bf16.msra.mxu1 %v5678_v63  ;;  %v5779_v62 = vld [vmem:[#allocation2 + $0x24] ss:$40 sps:$4 sm:$0xff]   ;;  %v5771_v63 = vld [vmem:[#allocation5 + $0x9e0] ss:$16 sps:$4 sm:$0xff]  }
 0x167   :  { %2966 = vmatprep.subr.bf16.mxu0 %v5683_v0  ;;  %3531 = vmatprep.subr.bf16.mxu1 %v5686_v1  ;;  %v5774_v0 = vld [vmem:[#allocation5 + $0x9e8] ss:$16 sps:$4 sm:$0xff]  }
 0x168   :  { %2899 = vmatprep.mubr.bf16.mxu0 %v5687_v3  ;;  %3464 = vmatprep.mubr.bf16.mxu1 %v5687_v3  ;;  %v5801_v1 = vld [vmem:[#allocation8 + $0x40] sm:$0xff]  }
 0x169   :  { %v5777_v3 = vld [vmem:[#allocation2 + $0x20] ss:$40 sps:$4 sm:$0xff]  }
 0x16a   :  { %2967 = vmatpush1.bf16.msra.mxu0 %v5681_v2  ;;  %3532 = vmatpush1.bf16.msra.mxu1 %v5684_v4  ;;  %v5803_v2 = vld [vmem:[#allocation8 + $0xc0] sm:$0xff]   ;;  %v5780_v4 = vld [vmem:[#allocation2 + $0x74] ss:$40 sps:$4 sm:$0xff]  }
 0x16b   :  { %2968 = vmatprep.subr.bf16.mxu0 %v5692_v5  ;;  %3533 = vmatprep.subr.bf16.mxu1 %v5695_v7  ;;  %v5802_v5 = vld [vmem:[#allocation8] sm:$0xff]   ;;  %v5805_v7 = vld [vmem:[#allocation8 + $0x48] sm:$0xff]  }
 0x16d   :  { %2900 = vmatmul.mubr.bf16.gmra.mrb[8].mxu0 %v5689_v6  ;;  %3465 = vmatmul.mubr.bf16.gmra.mrb[8].mxu1 %v5689_v6  ;;  %v5804_v6 = vld [vmem:[#allocation8 + $0x80] sm:$0xff]  }
 0x16e   :  { %2969 = vmatpush1.bf16.msra.mxu0 %v5690_v8  ;;  %3534 = vmatpush1.bf16.msra.mxu1 %v5693_v9  ;;  %v5807_v8 = vld [vmem:[#allocation8 + $0xc8] sm:$0xff]  }
 0x16f   :  { %2970 = vmatprep.subr.bf16.mxu0 %v5698_v10  ;;  %3535 = vmatprep.subr.bf16.mxu1 %v5701_v11  ;;  %v5806_v9 = vld [vmem:[#allocation8 + $0x8] sm:$0xff]   ;;  %v5809_v11 = vld [vmem:[#allocation8 + $0x50] sm:$0xff]  }
 0x170   :  { %2909 = vmatprep.mubr.bf16.mxu0 %v5702_v13  ;;  %3474 = vmatprep.mubr.bf16.mxu1 %v5702_v13  ;;  %v5808_v10 = vld [vmem:[#allocation8 + $0x88] sm:$0xff]  }
 0x171   :  { %v5782_v13 = vld [vmem:[#allocation2 + $0x70] ss:$40 sps:$4 sm:$0xff]  }
 0x172   :  { %2971 = vmatpush1.bf16.msra.mxu0 %v5696_v12  ;;  %3536 = vmatpush1.bf16.msra.mxu1 %v5699_v14  ;;  %v5811_v12 = vld [vmem:[#allocation8 + $0xd0] sm:$0xff]   ;;  %v5783_v14 = vld [vmem:[#allocation2 + $0xc4] ss:$40 sps:$4 sm:$0xff]  }
 0x173   :  { %2972 = vmatprep.subr.bf16.mxu0 %v5707_v15  ;;  %3537 = vmatprep.subr.bf16.mxu1 %v5710_v17  ;;  %v5810_v15 = vld [vmem:[#allocation8 + $0x10] sm:$0xff]   ;;  %v5813_v17 = vld [vmem:[#allocation8 + $0x58] sm:$0xff]  }
 0x175   :  { %2910 = vmatmul.mubr.bf16.gmra.mrb[12].mxu0 %v5704_v16  ;;  %3475 = vmatmul.mubr.bf16.gmra.mrb[12].mxu1 %v5704_v16  ;;  %v5812_v16 = vld [vmem:[#allocation8 + $0x90] sm:$0xff]  }
 0x176   :  { %2973 = vmatpush1.bf16.msra.mxu0 %v5705_v18  ;;  %3538 = vmatpush1.bf16.msra.mxu1 %v5708_v19  ;;  %v5815_v18 = vld [vmem:[#allocation8 + $0xd8] sm:$0xff]  }
 0x177   :  { %2974 = vmatprep.subr.bf16.mxu0 %v5713_v20  ;;  %3539 = vmatprep.subr.bf16.mxu1 %v5716_v21  ;;  %v5814_v19 = vld [vmem:[#allocation8 + $0x18] sm:$0xff]   ;;  %v5817_v21 = vld [vmem:[#allocation8 + $0x60] sm:$0xff]  }
 0x178   :  { %2919 = vmatprep.mubr.bf16.mxu0 %v5717_v23  ;;  %3484 = vmatprep.mubr.bf16.mxu1 %v5717_v23  ;;  %v5816_v20 = vld [vmem:[#allocation8 + $0x98] sm:$0xff]  }
 0x179   :  { %v5785_v23 = vld [vmem:[#allocation2 + $0xc0] ss:$40 sps:$4 sm:$0xff]  }
 0x17a   :  { %2975 = vmatpush1.bf16.msra.mxu0 %v5711_v22  ;;  %3540 = vmatpush1.bf16.msra.mxu1 %v5714_v24  ;;  %v5819_v22 = vld [vmem:[#allocation8 + $0xe0] sm:$0xff]   ;;  %v5786_v24 = vld [vmem:[#allocation2 + $0x114] ss:$40 sps:$4 sm:$0xff]  }
 0x17b   :  { %2976 = vmatprep.subr.bf16.mxu0 %v5722_v25  ;;  %3541 = vmatprep.subr.bf16.mxu1 %v5725_v27  ;;  %v5818_v25 = vld [vmem:[#allocation8 + $0x20] sm:$0xff]   ;;  %v5821_v27 = vld [vmem:[#allocation8 + $0x68] sm:$0xff]  }
 0x17d   :  { %2920 = vmatmul.mubr.bf16.gmra.mrb[16].mxu0 %v5719_v26  ;;  %3485 = vmatmul.mubr.bf16.gmra.mrb[16].mxu1 %v5719_v26  ;;  %v5820_v26 = vld [vmem:[#allocation8 + $0xa0] sm:$0xff]  }
 0x17e   :  { %2977 = vmatpush1.bf16.msra.mxu0 %v5720_v28  ;;  %3542 = vmatpush1.bf16.msra.mxu1 %v5723_v29  ;;  %v5823_v28 = vld [vmem:[#allocation8 + $0xe8] sm:$0xff]  }
 0x17f   :  { %2978 = vmatprep.subr.bf16.mxu0 %v5728_v30  ;;  %3543 = vmatprep.subr.bf16.mxu1 %v5731_v31  ;;  %v5822_v29 = vld [vmem:[#allocation8 + $0x28] sm:$0xff]   ;;  %v5825_v31 = vld [vmem:[#allocation8 + $0x70] sm:$0xff]  }
 0x180   :  { %2929 = vmatprep.mubr.bf16.mxu0 %v5732_v33  ;;  %3494 = vmatprep.mubr.bf16.mxu1 %v5732_v33  ;;  %v5824_v30 = vld [vmem:[#allocation8 + $0xa8] sm:$0xff]  }
 0x181   :  { %v5788_v33 = vld [vmem:[#allocation2 + $0x110] ss:$40 sps:$4 sm:$0xff]  }
 0x182   :  { %2979 = vmatpush1.bf16.msra.mxu0 %v5726_v32  ;;  %3544 = vmatpush1.bf16.msra.mxu1 %v5729_v34  ;;  %v5827_v32 = vld [vmem:[#allocation8 + $0xf0] sm:$0xff]   ;;  %v5789_v34 = vld [vmem:[#allocation2 + $0x164] ss:$40 sps:$4 sm:$0xff]  }
 0x183   :  { %2980 = vmatprep.subr.bf16.mxu0 %v5737_v35  ;;  %3545 = vmatprep.subr.bf16.mxu1 %v5740_v37  ;;  %v5826_v35 = vld [vmem:[#allocation8 + $0x30] sm:$0xff]   ;;  %v5791_v37 = vld [vmem:[#allocation2 + $0x160] ss:$40 sps:$4 sm:$0xff]  }
 0x185   :  { %2930 = vmatmul.mubr.bf16.gmra.mrb[20].mxu0 %v5734_v36  ;;  %3495 = vmatmul.mubr.bf16.gmra.mrb[20].mxu1 %v5734_v36  ;;  %v5828_v36 = vld [vmem:[#allocation8 + $0xb0] sm:$0xff]  }
 0x186   :  { %2981 = vmatpush1.bf16.msra.mxu0 %v5735_v38  ;;  %3546 = vmatpush1.bf16.msra.mxu1 %v5738_v39  ;;  %v5792_v38 = vld [vmem:[#allocation2 + $0x1b4] ss:$40 sps:$4 sm:$0xff]   ;;  %v5794_v39 = vld [vmem:[#allocation2 + $0x1b0] ss:$40 sps:$4 sm:$0xff]  }
 0x187   :  { %2982 = vmatprep.subr.bf16.mxu0 %v5743_v40  ;;  %3547 = vmatprep.subr.bf16.mxu1 %v5746_v41  ;;  %v5795_v40 = vld [vmem:[#allocation2 + $0x204] ss:$40 sps:$4 sm:$0xff]   ;;  %v5797_v41 = vld [vmem:[#allocation2 + $0x200] ss:$40 sps:$4 sm:$0xff]  }
 0x188   :  { %2939 = vmatprep.mubr.bf16.mxu0 %v5747_v42  ;;  %3504 = vmatprep.mubr.bf16.mxu1 %v5747_v42  ;;  %v5798_v42 = vld [vmem:[#allocation2 + $0x254] ss:$40 sps:$4 sm:$0xff]  }
 0x18a   :  { %2983 = vmatpush1.bf16.msra.mxu0 %v5741_v43  ;;  %3548 = vmatpush1.bf16.msra.mxu1 %v5744_v44  ;;  %v5800_v43 = vld [vmem:[#allocation2 + $0x250] ss:$40 sps:$4 sm:$0xff]   ;;  %v5829_v44 = vld [vmem:[#allocation8 + $0x78] sm:$0xff]  }
 0x18b   :  { %2984 = vmatprep.subr.bf16.mxu0 %v5752_v45  ;;  %3549 = vmatprep.subr.bf16.mxu1 %v5755_v46  ;;  %v5831_v45 = vld [vmem:[#allocation8 + $0xf8] sm:$0xff]  }
 0x18c   :  { %v5830_v46 = vld [vmem:[#allocation8 + $0x38] sm:$0xff]  }
 0x18d   :  { %2940 = vmatmul.mubr.bf16.gmra.mrb[24].mxu0 %v5749_v47  ;;  %3505 = vmatmul.mubr.bf16.gmra.mrb[24].mxu1 %v5749_v47  ;;  %v5832_v47 = vld [vmem:[#allocation8 + $0xb8] sm:$0xff]  }
 0x18e   :  { %2985 = vmatpush1.bf16.msra.mxu0 %v5750_v48  ;;  %3550 = vmatpush1.bf16.msra.mxu1 %v5753_v49  ;;  %v488_v48 = vlaneseq }
 0x18f   :  { %2986 = vmatprep.subr.bf16.mxu0 %v5758_v50  ;;  %3551 = vmatprep.subr.bf16.mxu1 %v5761_v51 }
 0x190   :  { %2949 = vmatprep.mubr.bf16.mxu0 %v5762_v52  ;;  %3514 = vmatprep.mubr.bf16.mxu1 %v5762_v52  ;;  %v489_v49 = vshrl.u32 %v488_v48, 7  ;;  %v486_v52 = vld [vmem:[#allocation7] sm:$0xf] }
 0x192   :  { %2987 = vmatpush1.bf16.msra.mxu0 %v5756_v53  ;;  %3552 = vmatpush1.bf16.msra.mxu1 %v5759_v54  ;;  %v490_v50 = vsub.s32 0, %v489_v49  ;;  %v498_v51 = vsub.s32 2, %v489_v49  ;;  %v494_v53 = vsub.s32 1, %v489_v49  ;;  %v502_v54 = vsub.s32 3, %v489_v49 }
 0x193   :  { %2988 = vmatprep.subr.bf16.mxu0 %v5767_v55  ;;  %3553 = vmatprep.subr.bf16.mxu1 %v5770_v56 }
 0x194   :  { %v6141_v55 = vrot.slane %v486_v52, %v490_v50  ;;  %v6143_v56 = vrot.slane %v486_v52, %v498_v51 }
 0x195   :  { %2950 = vmatmul.mubr.bf16.gmra.mrb[28].mxu0 %v5764_v57  ;;  %3515 = vmatmul.mubr.bf16.gmra.mrb[28].mxu1 %v5764_v57  ;;  %v6145_v57 = vrot.slane %v486_v52, %v494_v53 }
 0x196   :  { %2989 = vmatpush1.bf16.msra.mxu0 %v5765_v58  ;;  %3554 = vmatpush1.bf16.msra.mxu1 %v5768_v59  ;;  %v6147_v58 = vrot.slane %v486_v52, %v502_v54 }
 0x197   :  { %2990 = vmatprep.subr.bf16.mxu0 %v5773_v60  ;;  %3555 = vmatprep.subr.bf16.mxu1 %v5776_v61 }
 0x198   :  { %2992 = vmatprep.mubr.bf16.mxu0 %v5779_v62  ;;  %3557 = vmatprep.mubr.bf16.mxu1 %v5779_v62 }
 0x19a   :  { %2991 = vmatpush1.bf16.msra.mxu0 %v5771_v63  ;;  %3556 = vmatpush1.bf16.msra.mxu1 %v5774_v0 }
 0x19b   :  { %4739 = vmatprep.subr.bf16.mxu0 %v5801_v1  ;;  %4803 = vmatprep.subr.bf16.mxu1 %v5803_v2 }
 0x19d   :  { %2993 = vmatmul.mubr.bf16.vlgmr.msra.gmra.mrb[0].mxu0 %v5777_v3  ;;  %3558 = vmatmul.mubr.bf16.vlgmr.msra.gmra.mrb[0].mxu1 %v5777_v3 }
 0x19e   :  { %3002 = vmatprep.mubr.bf16.mxu0 %v5780_v4  ;;  %3567 = vmatprep.mubr.bf16.mxu1 %v5780_v4 }
 0x19f   :  { %4740 = vmatpush3.bf16.msra.mxu0 %v5802_v5  ;;  %4804 = vmatpush3.bf16.msra.mxu1 %v5804_v6 }
 0x1a0   :  { %4741 = vmatprep.subr.bf16.mxu0 %v5805_v7  ;;  %4805 = vmatprep.subr.bf16.mxu1 %v5807_v8 }
 0x1a3   :  { %4742 = vmatpush3.bf16.msra.mxu0 %v5806_v9  ;;  %4806 = vmatpush3.bf16.msra.mxu1 %v5808_v10 }
 0x1a4   :  { %4743 = vmatprep.subr.bf16.mxu0 %v5809_v11  ;;  %4807 = vmatprep.subr.bf16.mxu1 %v5811_v12 }
 0x1a5   :  { %3003 = vmatmul.mubr.bf16.gmra.mrb[4].mxu0 %v5782_v13  ;;  %3568 = vmatmul.mubr.bf16.gmra.mrb[4].mxu1 %v5782_v13 }
 0x1a6   :  { %3012 = vmatprep.mubr.bf16.mxu0 %v5783_v14  ;;  %3577 = vmatprep.mubr.bf16.mxu1 %v5783_v14 }
 0x1a7   :  { %4744 = vmatpush3.bf16.msra.mxu0 %v5810_v15  ;;  %4808 = vmatpush3.bf16.msra.mxu1 %v5812_v16 }
 0x1a8   :  { %4745 = vmatprep.subr.bf16.mxu0 %v5813_v17  ;;  %4809 = vmatprep.subr.bf16.mxu1 %v5815_v18 }
 0x1ab   :  { %4746 = vmatpush3.bf16.msra.mxu0 %v5814_v19  ;;  %4810 = vmatpush3.bf16.msra.mxu1 %v5816_v20 }
 0x1ac   :  { %4747 = vmatprep.subr.bf16.mxu0 %v5817_v21  ;;  %4811 = vmatprep.subr.bf16.mxu1 %v5819_v22 }
 0x1ad   :  { %3013 = vmatmul.mubr.bf16.gmra.mrb[8].mxu0 %v5785_v23  ;;  %3578 = vmatmul.mubr.bf16.gmra.mrb[8].mxu1 %v5785_v23 }
 0x1ae   :  { %3022 = vmatprep.mubr.bf16.mxu0 %v5786_v24  ;;  %3587 = vmatprep.mubr.bf16.mxu1 %v5786_v24 }
 0x1af   :  { %4748 = vmatpush3.bf16.msra.mxu0 %v5818_v25  ;;  %4812 = vmatpush3.bf16.msra.mxu1 %v5820_v26 }
 0x1b0   :  { %4749 = vmatprep.subr.bf16.mxu0 %v5821_v27  ;;  %4813 = vmatprep.subr.bf16.mxu1 %v5823_v28 }
 0x1b3   :  { %4750 = vmatpush3.bf16.msra.mxu0 %v5822_v29  ;;  %4814 = vmatpush3.bf16.msra.mxu1 %v5824_v30 }
 0x1b4   :  { %4751 = vmatprep.subr.bf16.mxu0 %v5825_v31  ;;  %4815 = vmatprep.subr.bf16.mxu1 %v5827_v32 }
 0x1b5   :  { %3023 = vmatmul.mubr.bf16.gmra.mrb[12].mxu0 %v5788_v33  ;;  %3588 = vmatmul.mubr.bf16.gmra.mrb[12].mxu1 %v5788_v33 }
 0x1b6   :  { %3032 = vmatprep.mubr.bf16.mxu0 %v5789_v34  ;;  %3597 = vmatprep.mubr.bf16.mxu1 %v5789_v34 }
 0x1b7   :  { %4752 = vmatpush3.bf16.msra.mxu0 %v5826_v35  ;;  %4816 = vmatpush3.bf16.msra.mxu1 %v5828_v36 }
 0x1b8   :  { %4753 = vmatprep.subr.bf16.mxu0 %v5829_v44  ;;  %4817 = vmatprep.subr.bf16.mxu1 %v5831_v45 }
 0x1bb   :  { %4754 = vmatpush3.bf16.msra.mxu0 %v5830_v46  ;;  %4818 = vmatpush3.bf16.msra.mxu1 %v5832_v47 }
 0x1bd   :  { %3033 = vmatmul.mubr.bf16.gmra.mrb[16].mxu0 %v5791_v37  ;;  %3598 = vmatmul.mubr.bf16.gmra.mrb[16].mxu1 %v5791_v37 }
 0x1be   :  { %3042 = vmatprep.mubr.bf16.mxu0 %v5792_v38  ;;  %3607 = vmatprep.mubr.bf16.mxu1 %v5792_v38 }
 0x1c5   :  { %3043 = vmatmul.mubr.bf16.gmra.mrb[20].mxu0 %v5794_v39  ;;  %3608 = vmatmul.mubr.bf16.gmra.mrb[20].mxu1 %v5794_v39 }
 0x1c6   :  { %3052 = vmatprep.mubr.bf16.mxu0 %v5795_v40  ;;  %3617 = vmatprep.mubr.bf16.mxu1 %v5795_v40 }
 0x1cd   :  { %3053 = vmatmul.mubr.bf16.gmra.mrb[24].mxu0 %v5797_v41  ;;  %3618 = vmatmul.mubr.bf16.gmra.mrb[24].mxu1 %v5797_v41 }
 0x1ce   :  { %3062 = vmatprep.mubr.bf16.mxu0 %v5798_v42  ;;  %3627 = vmatprep.mubr.bf16.mxu1 %v5798_v42 }
 0x1d5   :  { %3063 = vmatmul.mubr.bf16.gmra.mrb[28].mxu0 %v5800_v43  ;;  %3628 = vmatmul.mubr.bf16.gmra.mrb[28].mxu1 %v5800_v43 }
 0x270   :  { %v2994_v59 = vpop.f32.mrb[0].mxu0  ;;  %v3559_v60 = vpop.f32.mrb[0].mxu1 }
 0x271   :  { %v4867_v61 = vadd.f32 %v2994_v59, %v6141_v55  ;;  %v4899_v62 = vadd.f32 %v3559_v60, %v6143_v56  ;;  %v2996_v63 = vpop.f32.mrb[1].mxu0  ;;  %v3561_v0 = vpop.f32.mrb[1].mxu1 }
 0x272   :  { %v4868_v1 = vadd.f32 %v2996_v63, %v6145_v57  ;;  %v4900_v2 = vadd.f32 %v3561_v0, %v6147_v58  ;;  %v2998_v3 = vpop.f32.mrb[2].mxu0  ;;  %v3563_v4 = vpop.f32.mrb[2].mxu1 }
 0x273   :  { %v4869_v5 = vadd.f32 %v2998_v3, %v6141_v55  ;;  %v4901_v6 = vadd.f32 %v3563_v4, %v6143_v56  ;;  %v3000_v7 = vpop.f32.mrb[3].mxu0  ;;  %v3565_v8 = vpop.f32.mrb[3].mxu1  ;;  %v3638_v11 = vmax.f32 %v4867_v61, 0.0  ;;  %v3640_v12 = vmax.f32 %v4899_v62, 0.0 }
 0x274   :  { %v4870_v9 = vadd.f32 %v3000_v7, %v6145_v57  ;;  %v4902_v10 = vadd.f32 %v3565_v8, %v6147_v58  ;;  %v3639_v15 = vmax.f32 %v4868_v1, 0.0  ;;  %v3641_v16 = vmax.f32 %v4900_v2, 0.0 }
 0x275   :  { %v3642_v13 = vmax.f32 %v4869_v5, 0.0  ;;  %v3644_v14 = vmax.f32 %v4901_v6, 0.0 }
 0x276   :  { %v3643_v17 = vmax.f32 %v4870_v9, 0.0  ;;  %v3645_v18 = vmax.f32 %v4902_v10, 0.0 }
 0x277   :  { %v3702_v19 = vpack.c.bf16 %v3642_v13, %v3638_v11  ;;  %v3704_v20 = vpack.c.bf16 %v3644_v14, %v3640_v12 }
 0x278   :  { %v3703_v21 = vpack.c.bf16 %v3643_v17, %v3639_v15  ;;  %v3705_v22 = vpack.c.bf16 %v3645_v18, %v3641_v16  ;;  %v3004_v23 = vpop.f32.mrb[4].mxu0  ;;  %v3569_v24 = vpop.f32.mrb[4].mxu1 }
 0x279   :  { %v4871_v25 = vadd.f32 %v3004_v23, %v6141_v55  ;;  %v4903_v26 = vadd.f32 %v3569_v24, %v6143_v56  ;;  %v3006_v27 = vpop.f32.mrb[5].mxu0  ;;  %v3571_v28 = vpop.f32.mrb[5].mxu1 }
 0x27a   :  { %v4872_v29 = vadd.f32 %v3006_v27, %v6145_v57  ;;  %v4904_v30 = vadd.f32 %v3571_v28, %v6147_v58  ;;  %v3008_v31 = vpop.f32.mrb[6].mxu0  ;;  %v3573_v32 = vpop.f32.mrb[6].mxu1  ;;  %4029 = vmatprep.mubr.bf16.mxu0 %v3703_v21  ;;  %4126 = vmatprep.mubr.bf16.mxu1 %v3705_v22 }
 0x27b   :  { %v4873_v33 = vadd.f32 %v3008_v31, %v6141_v55  ;;  %v4905_v34 = vadd.f32 %v3573_v32, %v6143_v56  ;;  %v3010_v35 = vpop.f32.mrb[7].mxu0  ;;  %v3575_v36 = vpop.f32.mrb[7].mxu1  ;;  %4030 = vmatmul.mubr.bf16.vlgmr.msra.gmra.mrb[32].mxu0 %v3702_v19  ;;  %4127 = vmatmul.mubr.bf16.vlgmr.msra.gmra.mrb[32].mxu1 %v3704_v20  ;;  %v3646_v39 = vmax.f32 %v4871_v25, 0.0  ;;  %v3648_v40 = vmax.f32 %v4903_v26, 0.0 }
 0x27c   :  { %v4874_v37 = vadd.f32 %v3010_v35, %v6145_v57  ;;  %v4906_v38 = vadd.f32 %v3575_v36, %v6147_v58  ;;  %v3647_v43 = vmax.f32 %v4872_v29, 0.0  ;;  %v3649_v44 = vmax.f32 %v4904_v30, 0.0 }
 0x27d   :  { %v3650_v41 = vmax.f32 %v4873_v33, 0.0  ;;  %v3652_v42 = vmax.f32 %v4905_v34, 0.0 }
 0x27e   :  { %v3651_v45 = vmax.f32 %v4874_v37, 0.0  ;;  %v3653_v46 = vmax.f32 %v4906_v38, 0.0 }
 0x27f   :  { %v3706_v47 = vpack.c.bf16 %v3650_v41, %v3646_v39  ;;  %v3708_v48 = vpack.c.bf16 %v3652_v42, %v3648_v40 }
 0x280   :  { %v3707_v49 = vpack.c.bf16 %v3651_v45, %v3647_v43  ;;  %v3709_v50 = vpack.c.bf16 %v3653_v46, %v3649_v44  ;;  %v3014_v51 = vpop.f32.mrb[8].mxu0  ;;  %v3579_v52 = vpop.f32.mrb[8].mxu1 }
 0x281   :  { %v4875_v53 = vadd.f32 %v3014_v51, %v6141_v55  ;;  %v4907_v54 = vadd.f32 %v3579_v52, %v6143_v56  ;;  %v3016_v59 = vpop.f32.mrb[9].mxu0  ;;  %v3581_v60 = vpop.f32.mrb[9].mxu1 }
 0x282   :  { %v4876_v61 = vadd.f32 %v3016_v59, %v6145_v57  ;;  %v4908_v62 = vadd.f32 %v3581_v60, %v6147_v58  ;;  %v3018_v63 = vpop.f32.mrb[10].mxu0  ;;  %v3583_v0 = vpop.f32.mrb[10].mxu1  ;;  %4037 = vmatprep.mubr.bf16.mxu0 %v3707_v49  ;;  %4134 = vmatprep.mubr.bf16.mxu1 %v3709_v50 }
 0x283   :  { %v4877_v1 = vadd.f32 %v3018_v63, %v6141_v55  ;;  %v4909_v2 = vadd.f32 %v3583_v0, %v6143_v56  ;;  %v3020_v3 = vpop.f32.mrb[11].mxu0  ;;  %v3585_v4 = vpop.f32.mrb[11].mxu1  ;;  %4038 = vmatmul.mubr.bf16.gmra.mrb[36].mxu0 %v3706_v47  ;;  %4135 = vmatmul.mubr.bf16.gmra.mrb[36].mxu1 %v3708_v48  ;;  %v3654_v7 = vmax.f32 %v4875_v53, 0.0  ;;  %v3656_v8 = vmax.f32 %v4907_v54, 0.0 }
 0x284   :  { %v4878_v5 = vadd.f32 %v3020_v3, %v6145_v57  ;;  %v4910_v6 = vadd.f32 %v3585_v4, %v6147_v58  ;;  %v3655_v11 = vmax.f32 %v4876_v61, 0.0  ;;  %v3657_v12 = vmax.f32 %v4908_v62, 0.0 }
 0x285   :  { %v3658_v9 = vmax.f32 %v4877_v1, 0.0  ;;  %v3660_v10 = vmax.f32 %v4909_v2, 0.0 }
 0x286   :  { %v3659_v13 = vmax.f32 %v4878_v5, 0.0  ;;  %v3661_v14 = vmax.f32 %v4910_v6, 0.0 }
 0x287   :  { %v3710_v15 = vpack.c.bf16 %v3658_v9, %v3654_v7  ;;  %v3712_v16 = vpack.c.bf16 %v3660_v10, %v3656_v8 }
 0x288   :  { %v3711_v17 = vpack.c.bf16 %v3659_v13, %v3655_v11  ;;  %v3713_v18 = vpack.c.bf16 %v3661_v14, %v3657_v12  ;;  %v3024_v19 = vpop.f32.mrb[12].mxu0  ;;  %v3589_v20 = vpop.f32.mrb[12].mxu1 }
 0x289   :  { %v4879_v21 = vadd.f32 %v3024_v19, %v6141_v55  ;;  %v4911_v22 = vadd.f32 %v3589_v20, %v6143_v56  ;;  %v3026_v23 = vpop.f32.mrb[13].mxu0  ;;  %v3591_v24 = vpop.f32.mrb[13].mxu1 }
 0x28a   :  { %v4880_v25 = vadd.f32 %v3026_v23, %v6145_v57  ;;  %v4912_v26 = vadd.f32 %v3591_v24, %v6147_v58  ;;  %v3028_v27 = vpop.f32.mrb[14].mxu0  ;;  %v3593_v28 = vpop.f32.mrb[14].mxu1  ;;  %4045 = vmatprep.mubr.bf16.mxu0 %v3711_v17  ;;  %4142 = vmatprep.mubr.bf16.mxu1 %v3713_v18 }
 0x28b   :  { %v4881_v29 = vadd.f32 %v3028_v27, %v6141_v55  ;;  %v4913_v30 = vadd.f32 %v3593_v28, %v6143_v56  ;;  %v3030_v31 = vpop.f32.mrb[15].mxu0  ;;  %v3595_v32 = vpop.f32.mrb[15].mxu1  ;;  %4046 = vmatmul.mubr.bf16.gmra.mrb[40].mxu0 %v3710_v15  ;;  %4143 = vmatmul.mubr.bf16.gmra.mrb[40].mxu1 %v3712_v16  ;;  %v3662_v35 = vmax.f32 %v4879_v21, 0.0  ;;  %v3664_v36 = vmax.f32 %v4911_v22, 0.0 }
 0x28c   :  { %v4882_v33 = vadd.f32 %v3030_v31, %v6145_v57  ;;  %v4914_v34 = vadd.f32 %v3595_v32, %v6147_v58  ;;  %v3663_v39 = vmax.f32 %v4880_v25, 0.0  ;;  %v3665_v40 = vmax.f32 %v4912_v26, 0.0 }
 0x28d   :  { %v3666_v37 = vmax.f32 %v4881_v29, 0.0  ;;  %v3668_v38 = vmax.f32 %v4913_v30, 0.0 }
 0x28e   :  { %v3667_v41 = vmax.f32 %v4882_v33, 0.0  ;;  %v3669_v42 = vmax.f32 %v4914_v34, 0.0 }
 0x28f   :  { %v3714_v43 = vpack.c.bf16 %v3666_v37, %v3662_v35  ;;  %v3716_v44 = vpack.c.bf16 %v3668_v38, %v3664_v36 }
 0x290   :  { %v3715_v45 = vpack.c.bf16 %v3667_v41, %v3663_v39  ;;  %v3717_v46 = vpack.c.bf16 %v3669_v42, %v3665_v40  ;;  %v3034_v47 = vpop.f32.mrb[16].mxu0  ;;  %v3599_v48 = vpop.f32.mrb[16].mxu1 }
 0x291   :  { %v4883_v49 = vadd.f32 %v3034_v47, %v6141_v55  ;;  %v4915_v50 = vadd.f32 %v3599_v48, %v6143_v56  ;;  %v3036_v51 = vpop.f32.mrb[17].mxu0  ;;  %v3601_v52 = vpop.f32.mrb[17].mxu1 }
 0x292   :  { %v4884_v53 = vadd.f32 %v3036_v51, %v6145_v57  ;;  %v4916_v54 = vadd.f32 %v3601_v52, %v6147_v58  ;;  %v3038_v59 = vpop.f32.mrb[18].mxu0  ;;  %v3603_v60 = vpop.f32.mrb[18].mxu1  ;;  %4053 = vmatprep.mubr.bf16.mxu0 %v3715_v45  ;;  %4150 = vmatprep.mubr.bf16.mxu1 %v3717_v46 }
 0x293   :  { %v4885_v61 = vadd.f32 %v3038_v59, %v6141_v55  ;;  %v4917_v62 = vadd.f32 %v3603_v60, %v6143_v56  ;;  %v3040_v63 = vpop.f32.mrb[19].mxu0  ;;  %v3605_v0 = vpop.f32.mrb[19].mxu1  ;;  %4054 = vmatmul.mubr.bf16.gmra.mrb[44].mxu0 %v3714_v43  ;;  %4151 = vmatmul.mubr.bf16.gmra.mrb[44].mxu1 %v3716_v44  ;;  %v3670_v3 = vmax.f32 %v4883_v49, 0.0  ;;  %v3672_v4 = vmax.f32 %v4915_v50, 0.0 }
 0x294   :  { %v4886_v1 = vadd.f32 %v3040_v63, %v6145_v57  ;;  %v4918_v2 = vadd.f32 %v3605_v0, %v6147_v58  ;;  %v3671_v7 = vmax.f32 %v4884_v53, 0.0  ;;  %v3673_v8 = vmax.f32 %v4916_v54, 0.0 }
 0x295   :  { %v3674_v5 = vmax.f32 %v4885_v61, 0.0  ;;  %v3676_v6 = vmax.f32 %v4917_v62, 0.0 }
 0x296   :  { %v3675_v9 = vmax.f32 %v4886_v1, 0.0  ;;  %v3677_v10 = vmax.f32 %v4918_v2, 0.0 }
 0x297   :  { %v3718_v11 = vpack.c.bf16 %v3674_v5, %v3670_v3  ;;  %v3720_v12 = vpack.c.bf16 %v3676_v6, %v3672_v4 }
 0x298   :  { %v3719_v13 = vpack.c.bf16 %v3675_v9, %v3671_v7  ;;  %v3721_v14 = vpack.c.bf16 %v3677_v10, %v3673_v8  ;;  %v3044_v15 = vpop.f32.mrb[20].mxu0  ;;  %v3609_v16 = vpop.f32.mrb[20].mxu1 }
 0x299   :  { %v4887_v17 = vadd.f32 %v3044_v15, %v6141_v55  ;;  %v4919_v18 = vadd.f32 %v3609_v16, %v6143_v56  ;;  %v3046_v19 = vpop.f32.mrb[21].mxu0  ;;  %v3611_v20 = vpop.f32.mrb[21].mxu1 }
 0x29a   :  { %v4888_v21 = vadd.f32 %v3046_v19, %v6145_v57  ;;  %v4920_v22 = vadd.f32 %v3611_v20, %v6147_v58  ;;  %v3048_v23 = vpop.f32.mrb[22].mxu0  ;;  %v3613_v24 = vpop.f32.mrb[22].mxu1  ;;  %4061 = vmatprep.mubr.bf16.mxu0 %v3719_v13  ;;  %4158 = vmatprep.mubr.bf16.mxu1 %v3721_v14 }
 0x29b   :  { %v4889_v25 = vadd.f32 %v3048_v23, %v6141_v55  ;;  %v4921_v26 = vadd.f32 %v3613_v24, %v6143_v56  ;;  %v3050_v27 = vpop.f32.mrb[23].mxu0  ;;  %v3615_v28 = vpop.f32.mrb[23].mxu1  ;;  %4062 = vmatmul.mubr.bf16.gmra.mrb[48].mxu0 %v3718_v11  ;;  %4159 = vmatmul.mubr.bf16.gmra.mrb[48].mxu1 %v3720_v12  ;;  %v3678_v31 = vmax.f32 %v4887_v17, 0.0  ;;  %v3680_v32 = vmax.f32 %v4919_v18, 0.0 }
 0x29c   :  { %v4890_v29 = vadd.f32 %v3050_v27, %v6145_v57  ;;  %v4922_v30 = vadd.f32 %v3615_v28, %v6147_v58  ;;  %v3679_v35 = vmax.f32 %v4888_v21, 0.0  ;;  %v3681_v36 = vmax.f32 %v4920_v22, 0.0 }
 0x29d   :  { %v3682_v33 = vmax.f32 %v4889_v25, 0.0  ;;  %v3684_v34 = vmax.f32 %v4921_v26, 0.0 }
 0x29e   :  { %v3683_v37 = vmax.f32 %v4890_v29, 0.0  ;;  %v3685_v38 = vmax.f32 %v4922_v30, 0.0 }
 0x29f   :  { %v3722_v39 = vpack.c.bf16 %v3682_v33, %v3678_v31  ;;  %v3724_v40 = vpack.c.bf16 %v3684_v34, %v3680_v32 }
 0x2a0   :  { %v3723_v41 = vpack.c.bf16 %v3683_v37, %v3679_v35  ;;  %v3725_v42 = vpack.c.bf16 %v3685_v38, %v3681_v36  ;;  %v3054_v43 = vpop.f32.mrb[24].mxu0  ;;  %v3619_v44 = vpop.f32.mrb[24].mxu1  ;;  %v6213_v38 = vld [vmem:[#allocation10] ss:$0 sm:$0xff] }
 0x2a1   :  { %v4891_v45 = vadd.f32 %v3054_v43, %v6141_v55  ;;  %v4923_v46 = vadd.f32 %v3619_v44, %v6143_v56  ;;  %v3056_v47 = vpop.f32.mrb[25].mxu0  ;;  %v3621_v48 = vpop.f32.mrb[25].mxu1 }
 0x2a2   :  { %v4892_v49 = vadd.f32 %v3056_v47, %v6145_v57  ;;  %v4924_v50 = vadd.f32 %v3621_v48, %v6147_v58  ;;  %v3058_v51 = vpop.f32.mrb[26].mxu0  ;;  %v3623_v52 = vpop.f32.mrb[26].mxu1  ;;  %4069 = vmatprep.mubr.bf16.mxu0 %v3723_v41  ;;  %4166 = vmatprep.mubr.bf16.mxu1 %v3725_v42 }
 0x2a3   :  { %v4893_v53 = vadd.f32 %v3058_v51, %v6141_v55  ;;  %v4925_v54 = vadd.f32 %v3623_v52, %v6143_v56  ;;  %v3060_v59 = vpop.f32.mrb[27].mxu0  ;;  %v3625_v60 = vpop.f32.mrb[27].mxu1  ;;  %4070 = vmatmul.mubr.bf16.gmra.mrb[52].mxu0 %v3722_v39  ;;  %4167 = vmatmul.mubr.bf16.gmra.mrb[52].mxu1 %v3724_v40  ;;  %v3686_v63 = vmax.f32 %v4891_v45, 0.0  ;;  %v3688_v0 = vmax.f32 %v4923_v46, 0.0 }
 0x2a4   :  { %v4894_v61 = vadd.f32 %v3060_v59, %v6145_v57  ;;  %v4926_v62 = vadd.f32 %v3625_v60, %v6147_v58  ;;  %v3687_v3 = vmax.f32 %v4892_v49, 0.0  ;;  %v3689_v4 = vmax.f32 %v4924_v50, 0.0 }
 0x2a5   :  { %v3690_v1 = vmax.f32 %v4893_v53, 0.0  ;;  %v3692_v2 = vmax.f32 %v4925_v54, 0.0 }
 0x2a6   :  { %v3691_v5 = vmax.f32 %v4894_v61, 0.0  ;;  %v3693_v6 = vmax.f32 %v4926_v62, 0.0 }
 0x2a7   :  { %v3726_v7 = vpack.c.bf16 %v3690_v1, %v3686_v63  ;;  %v3728_v8 = vpack.c.bf16 %v3692_v2, %v3688_v0 }
 0x2a8   :  { %v3727_v9 = vpack.c.bf16 %v3691_v5, %v3687_v3  ;;  %v3729_v10 = vpack.c.bf16 %v3693_v6, %v3689_v4  ;;  %v3064_v11 = vpop.f32.mrb[28].mxu0  ;;  %v3629_v12 = vpop.f32.mrb[28].mxu1 }
 0x2a9   :  { %v4895_v13 = vadd.f32 %v3064_v11, %v6141_v55  ;;  %v4927_v14 = vadd.f32 %v3629_v12, %v6143_v56  ;;  %v3066_v15 = vpop.f32.mrb[29].mxu0  ;;  %v3631_v16 = vpop.f32.mrb[29].mxu1 }
 0x2aa   :  { %v4896_v17 = vadd.f32 %v3066_v15, %v6145_v57  ;;  %v4928_v18 = vadd.f32 %v3631_v16, %v6147_v58  ;;  %v3068_v19 = vpop.f32.mrb[30].mxu0  ;;  %v3633_v20 = vpop.f32.mrb[30].mxu1  ;;  %4077 = vmatprep.mubr.bf16.mxu0 %v3727_v9  ;;  %4174 = vmatprep.mubr.bf16.mxu1 %v3729_v10 }
 0x2ab   :  { %v4897_v21 = vadd.f32 %v3068_v19, %v6141_v55  ;;  %v4929_v22 = vadd.f32 %v3633_v20, %v6143_v56  ;;  %v3070_v23 = vpop.f32.mrb[31].mxu0  ;;  %v3635_v24 = vpop.f32.mrb[31].mxu1  ;;  %4078 = vmatmul.mubr.bf16.gmra.mrb[56].mxu0 %v3726_v7  ;;  %4175 = vmatmul.mubr.bf16.gmra.mrb[56].mxu1 %v3728_v8  ;;  %v3694_v27 = vmax.f32 %v4895_v13, 0.0  ;;  %v3696_v28 = vmax.f32 %v4927_v14, 0.0 }
 0x2ac   :  { %v4898_v25 = vadd.f32 %v3070_v23, %v6145_v57  ;;  %v4930_v26 = vadd.f32 %v3635_v24, %v6147_v58  ;;  %v3695_v31 = vmax.f32 %v4896_v17, 0.0  ;;  %v3697_v32 = vmax.f32 %v4928_v18, 0.0 }
 0x2ad   :  { %v3698_v29 = vmax.f32 %v4897_v21, 0.0  ;;  %v3700_v30 = vmax.f32 %v4929_v22, 0.0 }
 0x2ae   :  { %v3699_v33 = vmax.f32 %v4898_v25, 0.0  ;;  %v3701_v34 = vmax.f32 %v4930_v26, 0.0 }
 0x2af   :  { %v3730_v35 = vpack.c.bf16 %v3698_v29, %v3694_v27  ;;  %v3732_v55 = vpack.c.bf16 %v3700_v30, %v3696_v28 }
 0x2b0   :  { %v3731_v36 = vpack.c.bf16 %v3699_v33, %v3695_v31  ;;  %v3733_v56 = vpack.c.bf16 %v3701_v34, %v3697_v32 }
 0x2b2   :  { %4085 = vmatprep.mubr.bf16.mxu0 %v3731_v36  ;;  %4182 = vmatprep.mubr.bf16.mxu1 %v3733_v56 }
 0x2b3   :  { %4086 = vmatmul.mubr.bf16.gmra.mrb[60].mxu0 %v3730_v35  ;;  %4183 = vmatmul.mubr.bf16.gmra.mrb[60].mxu1 %v3732_v55 }
 0x34e   :  { %v4755_v37 = vpop.f32.mrb[32].mxu0  ;;  %v4819_v57 = vpop.f32.mrb[32].mxu1 }
 0x34f   :  { %v4756_v58 = vpop.f32.mrb[33].mxu0  ;;  %v4820_v39 = vpop.f32.mrb[33].mxu1 }
 0x350   :  { %v4757_v40 = vadd.f32 %v4756_v58, %v4755_v37  ;;  %v4821_v41 = vadd.f32 %v4820_v39, %v4819_v57  ;;  %v4758_v42 = vpop.f32.mrb[34].mxu0  ;;  %v4822_v43 = vpop.f32.mrb[34].mxu1 }
 0x351   :  { %v4759_v44 = vpop.f32.mrb[35].mxu0  ;;  %v4823_v45 = vpop.f32.mrb[35].mxu1 }
 0x352   :  { %v4032_v46 = vadd.f32 %v4757_v40, %v6213_v38  ;;  %v4760_v47 = vadd.f32 %v4759_v44, %v4758_v42  ;;  %v4824_v48 = vadd.f32 %v4823_v45, %v4822_v43 }
 0x354   :  { %v4129_v49 = vadd.f32 %v4821_v41, %v4032_v46  ;;  %v4035_v50 = vadd.f32 %v4760_v47, %v6213_v38 }
 0x356   :  { %v4191_v51 = vsub.f32 0.0, %v4129_v49  ;;  %v4132_v52 = vadd.f32 %v4824_v48, %v4035_v50  ;;  %v4761_v53 = vpop.f32.mrb[36].mxu0  ;;  %v4825_v54 = vpop.f32.mrb[36].mxu1 }
 0x357   :  { %v4762_v59 = vpop.f32.mrb[37].mxu0  ;;  %v4826_v60 = vpop.f32.mrb[37].mxu1 }
 0x358   :  { %v4207_v61 = vmul.f32 1.442695, %v4191_v51  ;;  %v4192_v62 = vsub.f32 0.0, %v4132_v52  ;;  %v4763_v63 = vadd.f32 %v4762_v59, %v4761_v53  ;;  %v4827_v0 = vadd.f32 %v4826_v60, %v4825_v54  ;;  %v4764_v1 = vpop.f32.mrb[38].mxu0  ;;  %v4828_v2 = vpop.f32.mrb[38].mxu1 }
 0x359   :  { %v4765_v3 = vpop.f32.mrb[39].mxu0  ;;  %v4829_v4 = vpop.f32.mrb[39].mxu1 }
 0x35a   :  { %5833 = vpow2.f32 %v4207_v61  ;;  %v4209_v5 = vmul.f32 1.442695, %v4192_v62  ;;  %v4040_v6 = vadd.f32 %v4763_v63, %v6213_v38  ;;  %v4766_v7 = vadd.f32 %v4765_v3, %v4764_v1 }
 0x35b   :  { %v4830_v8 = vadd.f32 %v4829_v4, %v4828_v2 }
 0x35c   :  { %5835 = vpow2.f32 %v4209_v5  ;;  %v4137_v9 = vadd.f32 %v4827_v0, %v4040_v6  ;;  %v4043_v10 = vadd.f32 %v4766_v7, %v6213_v38 }
 0x35e   :  { %v4193_v11 = vsub.f32 0.0, %v4137_v9  ;;  %v4140_v12 = vadd.f32 %v4830_v8, %v4043_v10  ;;  %v4767_v13 = vpop.f32.mrb[40].mxu0  ;;  %v4831_v14 = vpop.f32.mrb[40].mxu1 }
 0x35f   :  { %v4768_v15 = vpop.f32.mrb[41].mxu0  ;;  %v4832_v16 = vpop.f32.mrb[41].mxu1 }
 0x360   :  { %v4211_v17 = vmul.f32 1.442695, %v4193_v11  ;;  %v4194_v18 = vsub.f32 0.0, %v4140_v12  ;;  %v4769_v19 = vadd.f32 %v4768_v15, %v4767_v13  ;;  %v4833_v20 = vadd.f32 %v4832_v16, %v4831_v14  ;;  %v4770_v21 = vpop.f32.mrb[42].mxu0  ;;  %v4834_v22 = vpop.f32.mrb[42].mxu1 }
 0x361   :  { %v4771_v23 = vpop.f32.mrb[43].mxu0  ;;  %v4835_v24 = vpop.f32.mrb[43].mxu1 }
 0x362   :  { %5837 = vpow2.f32 %v4211_v17  ;;  %v4213_v25 = vmul.f32 1.442695, %v4194_v18  ;;  %v4048_v26 = vadd.f32 %v4769_v19, %v6213_v38  ;;  %v4772_v27 = vadd.f32 %v4771_v23, %v4770_v21 }
 0x363   :  { %v4836_v28 = vadd.f32 %v4835_v24, %v4834_v22 }
 0x364   :  { %v5834_v29 = vpop.eup %5833  ;;  %5839 = vpow2.f32 %v4213_v25  ;;  %v4145_v30 = vadd.f32 %v4833_v20, %v4048_v26  ;;  %v4051_v31 = vadd.f32 %v4772_v27, %v6213_v38 }
 0x365   :  { %v4239_v32 = vadd.f32 1.0, %v5834_v29 }
 0x366   :  { %v5836_v33 = vpop.eup %5835  ;;  %v4195_v34 = vsub.f32 0.0, %v4145_v30  ;;  %v4148_v35 = vadd.f32 %v4836_v28, %v4051_v31  ;;  %v4773_v55 = vpop.f32.mrb[44].mxu0 }
 0x367   :  { %v4837_v36 = vpop.f32.mrb[44].mxu1  ;;  %5841 = vrcp.f32 %v4239_v32  ;;  %v4240_v56 = vadd.f32 1.0, %v5836_v33  ;;  %v4774_v37 = vpop.f32.mrb[45].mxu0 }
 0x368   :  { %v4838_v57 = vpop.f32.mrb[45].mxu1  ;;  %v4215_v58 = vmul.f32 1.442695, %v4195_v34  ;;  %v4196_v39 = vsub.f32 0.0, %v4148_v35  ;;  %v4775_v40 = vadd.f32 %v4774_v37, %v4773_v55  ;;  %v4776_v42 = vpop.f32.mrb[46].mxu0 }
 0x369   :  { %v4839_v41 = vadd.f32 %v4838_v57, %v4837_v36  ;;  %v4840_v43 = vpop.f32.mrb[46].mxu1  ;;  %5843 = vrcp.f32 %v4240_v56  ;;  %v4777_v44 = vpop.f32.mrb[47].mxu0 }
 0x36a   :  { %v4841_v45 = vpop.f32.mrb[47].mxu1  ;;  %5845 = vpow2.f32 %v4215_v58  ;;  %v4217_v46 = vmul.f32 1.442695, %v4196_v39  ;;  %v4056_v47 = vadd.f32 %v4775_v40, %v6213_v38  ;;  %v4778_v48 = vadd.f32 %v4777_v44, %v4776_v42 }
 0x36b   :  { %v4842_v49 = vadd.f32 %v4841_v45, %v4840_v43 }
 0x36c   :  { %v5838_v50 = vpop.eup %5837  ;;  %5847 = vpow2.f32 %v4217_v46  ;;  %v4153_v51 = vadd.f32 %v4839_v41, %v4056_v47  ;;  %v4059_v52 = vadd.f32 %v4778_v48, %v6213_v38 }
 0x36d   :  { %v4241_v53 = vadd.f32 1.0, %v5838_v50 }
 0x36e   :  { %v5840_v54 = vpop.eup %5839  ;;  %v4197_v59 = vsub.f32 0.0, %v4153_v51  ;;  %v4156_v60 = vadd.f32 %v4842_v49, %v4059_v52  ;;  %v4779_v61 = vpop.f32.mrb[48].mxu0 }
 0x36f   :  { %v4843_v62 = vpop.f32.mrb[48].mxu1  ;;  %5849 = vrcp.f32 %v4241_v53  ;;  %v4242_v63 = vadd.f32 1.0, %v5840_v54  ;;  %v4780_v0 = vpop.f32.mrb[49].mxu0 }
 0x370   :  { %v4844_v1 = vpop.f32.mrb[49].mxu1  ;;  %v4219_v2 = vmul.f32 1.442695, %v4197_v59  ;;  %v4198_v3 = vsub.f32 0.0, %v4156_v60  ;;  %v4781_v4 = vadd.f32 %v4780_v0, %v4779_v61  ;;  %v4782_v6 = vpop.f32.mrb[50].mxu0 }
 0x371   :  { %v4845_v5 = vadd.f32 %v4844_v1, %v4843_v62  ;;  %v4846_v7 = vpop.f32.mrb[50].mxu1  ;;  %v5842_v8 = vpop.eup %5841  ;;  %5851 = vrcp.f32 %v4242_v63 }
 0x372   :  { %v4783_v9 = vpop.f32.mrb[51].mxu0  ;;  %v4847_v10 = vpop.f32.mrb[51].mxu1  ;;  %4271 = vst [vmem:[#allocation11] sm:$0xff] %v5842_v8  ;;  %5853 = vpow2.f32 %v4219_v2  ;;  %v4221_v11 = vmul.f32 1.442695, %v4198_v3  ;;  %v4064_v12 = vadd.f32 %v4781_v4, %v6213_v38 }
 0x373   :  { %v4784_v13 = vadd.f32 %v4783_v9, %v4782_v6  ;;  %v5844_v14 = vpop.eup %5843  ;;  %v4848_v15 = vadd.f32 %v4847_v10, %v4846_v7 }
 0x374   :  { %v5846_v16 = vpop.eup %5845  ;;  %4272 = vst [vmem:[#allocation11 + $0x8] sm:$0xff] %v5844_v14  ;;  %5855 = vpow2.f32 %v4221_v11  ;;  %v4161_v17 = vadd.f32 %v4845_v5, %v4064_v12 }
 0x375   :  { %v4067_v18 = vadd.f32 %v4784_v13, %v6213_v38  ;;  %v4243_v19 = vadd.f32 1.0, %v5846_v16 }
 0x376   :  { %v5848_v20 = vpop.eup %5847  ;;  %v4199_v21 = vsub.f32 0.0, %v4161_v17  ;;  %v4785_v23 = vpop.f32.mrb[52].mxu0 }
 0x377   :  { %v4164_v22 = vadd.f32 %v4848_v15, %v4067_v18  ;;  %v4849_v24 = vpop.f32.mrb[52].mxu1  ;;  %5857 = vrcp.f32 %v4243_v19  ;;  %v4244_v25 = vadd.f32 1.0, %v5848_v20  ;;  %v4786_v26 = vpop.f32.mrb[53].mxu0 }
 0x378   :  { %v4850_v27 = vpop.f32.mrb[53].mxu1  ;;  %v4223_v28 = vmul.f32 1.442695, %v4199_v21  ;;  %v4787_v30 = vadd.f32 %v4786_v26, %v4785_v23  ;;  %v4788_v32 = vpop.f32.mrb[54].mxu0 }
 0x379   :  { %v4200_v29 = vsub.f32 0.0, %v4164_v22  ;;  %v4851_v31 = vadd.f32 %v4850_v27, %v4849_v24  ;;  %v4852_v33 = vpop.f32.mrb[54].mxu1  ;;  %v5850_v34 = vpop.eup %5849  ;;  %5859 = vrcp.f32 %v4244_v25 }
 0x37a   :  { %v4789_v35 = vpop.f32.mrb[55].mxu0  ;;  %v4853_v55 = vpop.f32.mrb[55].mxu1  ;;  %4273 = vst [vmem:[#allocation11 + $0x10] sm:$0xff] %v5850_v34  ;;  %5861 = vpow2.f32 %v4223_v28  ;;  %v4072_v56 = vadd.f32 %v4787_v30, %v6213_v38 }
 0x37b   :  { %v4225_v36 = vmul.f32 1.442695, %v4200_v29  ;;  %v4790_v37 = vadd.f32 %v4789_v35, %v4788_v32  ;;  %v5852_v57 = vpop.eup %5851  ;;  %v4854_v58 = vadd.f32 %v4853_v55, %v4852_v33 }
 0x37c   :  { %v5854_v39 = vpop.eup %5853  ;;  %4274 = vst [vmem:[#allocation11 + $0x18] sm:$0xff] %v5852_v57  ;;  %v4169_v40 = vadd.f32 %v4851_v31, %v4072_v56 }
 0x37d   :  { %5863 = vpow2.f32 %v4225_v36  ;;  %v4075_v41 = vadd.f32 %v4790_v37, %v6213_v38  ;;  %v4245_v42 = vadd.f32 1.0, %v5854_v39 }
 0x37e   :  { %v5856_v43 = vpop.eup %5855  ;;  %v4201_v44 = vsub.f32 0.0, %v4169_v40  ;;  %v4791_v46 = vpop.f32.mrb[56].mxu0 }
 0x37f   :  { %v4172_v45 = vadd.f32 %v4854_v58, %v4075_v41  ;;  %v4855_v47 = vpop.f32.mrb[56].mxu1  ;;  %5865 = vrcp.f32 %v4245_v42  ;;  %v4246_v48 = vadd.f32 1.0, %v5856_v43  ;;  %v4792_v49 = vpop.f32.mrb[57].mxu0 }
 0x380   :  { %v4856_v50 = vpop.f32.mrb[57].mxu1  ;;  %v4227_v51 = vmul.f32 1.442695, %v4201_v44  ;;  %v4793_v53 = vadd.f32 %v4792_v49, %v4791_v46  ;;  %v4794_v59 = vpop.f32.mrb[58].mxu0 }
 0x381   :  { %v4202_v52 = vsub.f32 0.0, %v4172_v45  ;;  %v4857_v54 = vadd.f32 %v4856_v50, %v4855_v47  ;;  %v4858_v60 = vpop.f32.mrb[58].mxu1  ;;  %v5858_v61 = vpop.eup %5857  ;;  %5867 = vrcp.f32 %v4246_v48 }
 0x382   :  { %v4795_v62 = vpop.f32.mrb[59].mxu0  ;;  %v4859_v63 = vpop.f32.mrb[59].mxu1  ;;  %4275 = vst [vmem:[#allocation11 + $0x20] sm:$0xff] %v5858_v61  ;;  %5869 = vpow2.f32 %v4227_v51  ;;  %v4080_v1 = vadd.f32 %v4793_v53, %v6213_v38 }
 0x383   :  { %v4229_v0 = vmul.f32 1.442695, %v4202_v52  ;;  %v4796_v2 = vadd.f32 %v4795_v62, %v4794_v59  ;;  %v5860_v3 = vpop.eup %5859  ;;  %v4860_v4 = vadd.f32 %v4859_v63, %v4858_v60 }
 0x384   :  { %v5862_v5 = vpop.eup %5861  ;;  %4276 = vst [vmem:[#allocation11 + $0x28] sm:$0xff] %v5860_v3  ;;  %v4177_v6 = vadd.f32 %v4857_v54, %v4080_v1 }
 0x385   :  { %5871 = vpow2.f32 %v4229_v0  ;;  %v4083_v7 = vadd.f32 %v4796_v2, %v6213_v38  ;;  %v4247_v8 = vadd.f32 1.0, %v5862_v5 }
 0x386   :  { %v4203_v10 = vsub.f32 0.0, %v4177_v6  ;;  %v4797_v12 = vpop.f32.mrb[60].mxu0  ;;  %v4861_v13 = vpop.f32.mrb[60].mxu1 }
 0x387   :  { %v5864_v9 = vpop.eup %5863  ;;  %v4180_v11 = vadd.f32 %v4860_v4, %v4083_v7  ;;  %5873 = vrcp.f32 %v4247_v8  ;;  %v4798_v15 = vpop.f32.mrb[61].mxu0 }
 0x388   :  { %v4248_v14 = vadd.f32 1.0, %v5864_v9  ;;  %v4862_v16 = vpop.f32.mrb[61].mxu1  ;;  %v4231_v17 = vmul.f32 1.442695, %v4203_v10  ;;  %v4799_v19 = vadd.f32 %v4798_v15, %v4797_v12  ;;  %v4800_v21 = vpop.f32.mrb[62].mxu0 }
 0x389   :  { %v4204_v18 = vsub.f32 0.0, %v4180_v11  ;;  %v4863_v20 = vadd.f32 %v4862_v16, %v4861_v13  ;;  %v4864_v22 = vpop.f32.mrb[62].mxu1  ;;  %v5866_v23 = vpop.eup %5865 }
 0x38a   :  { %5875 = vrcp.f32 %v4248_v14  ;;  %v4801_v24 = vpop.f32.mrb[63].mxu0  ;;  %v4865_v25 = vpop.f32.mrb[63].mxu1  ;;  %4277 = vst [vmem:[#allocation11 + $0x30] sm:$0xff] %v5866_v23  ;;  %v4088_v27 = vadd.f32 %v4799_v19, %v6213_v38 }
 0x38b   :  { %5877 = vpow2.f32 %v4231_v17  ;;  %v4233_v26 = vmul.f32 1.442695, %v4204_v18  ;;  %v4802_v28 = vadd.f32 %v4801_v24, %v4800_v21  ;;  %v5868_v29 = vpop.eup %5867  ;;  %v4866_v30 = vadd.f32 %v4865_v25, %v4864_v22 }
 0x38c   :  { %v5870_v31 = vpop.eup %5869  ;;  %4278 = vst [vmem:[#allocation11 + $0x38] sm:$0xff] %v5868_v29  ;;  %v4185_v32 = vadd.f32 %v4863_v20, %v4088_v27 }
 0x38d   :  { %5879 = vpow2.f32 %v4233_v26  ;;  %v4091_v33 = vadd.f32 %v4802_v28, %v6213_v38  ;;  %v4249_v34 = vadd.f32 1.0, %v5870_v31 }
 0x38e   :  { %v4205_v55 = vsub.f32 0.0, %v4185_v32 }
 0x38f   :  { %v5872_v35 = vpop.eup %5871  ;;  %v4188_v36 = vadd.f32 %v4866_v30, %v4091_v33  ;;  %5881 = vrcp.f32 %v4249_v34 }
 0x390   :  { %v4250_v56 = vadd.f32 1.0, %v5872_v35  ;;  %v4235_v37 = vmul.f32 1.442695, %v4205_v55 }
 0x391   :  { %v4206_v57 = vsub.f32 0.0, %v4188_v36  ;;  %v5874_v58 = vpop.eup %5873 }
 0x392   :  { %5883 = vrcp.f32 %v4250_v56  ;;  %4279 = vst [vmem:[#allocation11 + $0x40] sm:$0xff] %v5874_v58 }
 0x393   :  { %5885 = vpow2.f32 %v4235_v37  ;;  %v4237_v39 = vmul.f32 1.442695, %v4206_v57 }
 0x394   :  { %v5876_v40 = vpop.eup %5875 }
 0x395   :  { %v5878_v41 = vpop.eup %5877  ;;  %4280 = vst [vmem:[#allocation11 + $0x48] sm:$0xff] %v5876_v40  ;;  %5887 = vpow2.f32 %v4237_v39 }
 0x396   :  { %v4251_v42 = vadd.f32 1.0, %v5878_v41 }
 0x397   :  { %v5880_v43 = vpop.eup %5879 }
 0x398   :  { %5889 = vrcp.f32 %v4251_v42  ;;  %v4252_v38 = vadd.f32 1.0, %v5880_v43 }
 0x399   :  { %v5882_v44 = vpop.eup %5881 }
 0x39a   :  { %5891 = vrcp.f32 %v4252_v38  ;;  %4281 = vst [vmem:[#allocation11 + $0x50] sm:$0xff] %v5882_v44 }
 0x39c   :  { %v5884_v45 = vpop.eup %5883 }
 0x39d   :  { %v5886_v46 = vpop.eup %5885  ;;  %4282 = vst [vmem:[#allocation11 + $0x58] sm:$0xff] %v5884_v45 }
 0x39e   :  { %v4253_v47 = vadd.f32 1.0, %v5886_v46 }
 0x39f   :  { %v5888_v48 = vpop.eup %5887 }
 0x3a0   :  { %5893 = vrcp.f32 %v4253_v47  ;;  %v4254_v49 = vadd.f32 1.0, %v5888_v48 }
 0x3a2   :  { %v5890_v50 = vpop.eup %5889  ;;  %5895 = vrcp.f32 %v4254_v49 }
 0x3a3   :  { %4283 = vst [vmem:[#allocation11 + $0x60] sm:$0xff] %v5890_v50 }
 0x3a4   :  { %v5892_v51 = vpop.eup %5891 }
 0x3a5   :  { %4284 = vst [vmem:[#allocation11 + $0x68] sm:$0xff] %v5892_v51 }
 0x3aa   :  { %v5894_v52 = vpop.eup %5893 }
 0x3ab   :  { %4285 = vst [vmem:[#allocation11 + $0x70] sm:$0xff] %v5894_v52 }
 0x3ac   :  { %v5896_v53 = vpop.eup %5895 }
 0x3ad   :  { %4286 = vst [vmem:[#allocation11 + $0x78] sm:$0xff] %v5896_v53 }
 0x3ae   :  { %6018 = shalt.err (!%p6015_p2)
}
 0x3af   :  { %s6019_s8 = scalar_lea.hbm %s6248_s5, 2048 }
 0x3b0   :  { %p6020_p3 = scmp.ne.s32.totalorder %s6248_s5, %s6019_s8  ;;  %p6023_p4 = scmp.lt.u32.totalorder %s6019_s8, %s6248_s5 }
 0x3b2   :  { %p6025_p5 = pnand %p6023_p4, %p6020_p3 }
 0x3b4   :  { %6028 = shalt.err (!%p6025_p5)
}
 0x3b5   :  { %s6049_s13 = smov 128   ;;  %s6050_s14 = smov 8  }
 0x3b6   :  { %4298 = dma.vmem_to_hbm [thread:$0]  %s4293_s3, 2048, %s6248_s5, [#allocation4], %s6049_s13, %s6049_s13, %s6050_s14  }
 0x3b7   :  { %6035 = dma.done.wait [#allocation4], 2048  }
 0x3b8   :  { %6036 = vsyncadd [#allocation4], 4294965248 }
 0x3b9   :  { %4302 = vsyncpa [#allocation3], 1 }
 0x3ba   :  { %4303 = vsyncpa [#allocation6], 1 }
 0x3bb   :  { %4304 = vsyncpa [#allocation9], 1 }
 0x3bc   :  { %4305 = vsyncpa [#allocation4], 1 }

</bundles_post_ra>
